<compile_context>
chip_gen: v6e
topology: v6e:2x2x1
jax: 0.10.0
libtpu: 0.0.40
codegen_flags: <defaults>
</compile_context>

<pallas_src>
import math
from functools import partial

import jax
import jax.numpy as jnp
from jax.experimental import pallas as pl
from jax.experimental.pallas import tpu as pltpu

_EPS = 1e-6


# ---------------------------------------------------------------------------
# Generation-aware compile parameters
# ---------------------------------------------------------------------------
def _pick_vmem_limit():
    try:
        kind = jax.devices()[0].device_kind.lower()
    except Exception:
        return None
    if "v7" in kind or "tpu7" in kind:
        return 40 * 1024 * 1024          # v7x: 64 MiB physical -> leave headroom
    if "v5 lite" in kind or "v5e" in kind or "v6" in kind:
        return 96 * 1024 * 1024          # v5e/v6e: 128 MiB physical
    return None                          # unknown gen: compiler default


_VMEM_LIMIT = _pick_vmem_limit()
_MAX_ROW_TILE = 1024 if _VMEM_LIMIT == 96 * 1024 * 1024 else 512


def _compiler_params(dims):
    kw = dict(dimension_semantics=dims)
    if _VMEM_LIMIT is not None:
        kw["vmem_limit_bytes"] = _VMEM_LIMIT
    return pltpu.CompilerParams(**kw)


def _row_tile(rows: int) -> int:
    """Multiple-of-8 row tile giving >=2 grid steps when possible (megacore).
    Partial last blocks are handled by the pl.cdiv grid."""
    if rows <= 8:
        return rows
    half = -(-rows // 2)                 # ceil(rows / 2)
    t = ((half + 7) // 8) * 8            # round up to multiple of 8
    return max(8, min(_MAX_ROW_TILE, t))


def _layernorm_f32(x, alpha, bias, eps):
    """Custom LayerNormalisation: scalar alpha/bias, Bessel-corrected std
    (matches torch.std default, NOT nn.LayerNorm)."""
    d = x.shape[-1]
    mean = jnp.mean(x, axis=-1, keepdims=True)
    diff = x - mean
    std = jnp.sqrt(jnp.sum(diff * diff, axis=-1, keepdims=True) / (d - 1))
    return alpha * diff / (std + eps) + bias


# ---------------------------------------------------------------------------
# Kernel bodies
# ---------------------------------------------------------------------------
def _make_proj_kernel(has_ln, splits, eps=_EPS):
    """out_i = (LN?(x) @ w + b)[:, split_i]; bf16 operands, fp32 accumulation."""
    def kernel(*refs):
        idx = 0
        if has_ln:
            alpha_ref, bias_ref = refs[0], refs[1]
            idx = 2
        x_ref, w_ref, b_ref = refs[idx], refs[idx + 1], refs[idx + 2]
        out_refs = refs[idx + 3:]

        x = x_ref[...].astype(jnp.float32)
        if has_ln:
            x = _layernorm_f32(x, alpha_ref[0], bias_ref[0], eps)
        acc = jnp.dot(x.astype(jnp.bfloat16), w_ref[...],
                      preferred_element_type=jnp.float32)
        acc = acc + b_ref[...].astype(jnp.float32)
        start = 0
        for o_ref, size in zip(out_refs, splits):
            o_ref[...] = acc[:, start:start + size].astype(o_ref.dtype)
            start += size
    return kernel


def _attn_kernel(q_ref, k_ref, v_ref, m_ref, wo_ref, bo_ref, r_ref, o_ref, *, scale):
    """One batch, all heads: softmax(q k^T * scale, masked) @ v, then the w_o
    projection + bias + residual fused in; lane-dense (Sq, D) output."""
    q = q_ref[0]                                   # (H, Sq, dk) bf16
    k = k_ref[0]                                   # (H, Sk, dk) bf16
    v = v_ref[0]                                   # (H, Sk, dk) bf16
    m = m_ref[0]                                   # (Sq, Sk) int32, 1 = keep

    scores = jnp.einsum("hqd,hkd->hqk", q, k,
                        preferred_element_type=jnp.float32) * scale
    scores = jnp.where(m[None, :, :] == 0, jnp.float32(-1e20), scores)
    smax = jnp.max(scores, axis=-1, keepdims=True)
    p = jnp.exp(scores - smax)
    denom = jnp.sum(p, axis=-1, keepdims=True)
    p = p * pl.reciprocal(denom, approx=True)

    ctx = jnp.einsum("hqk,hkd->hqd", p.astype(jnp.bfloat16), v,
                     preferred_element_type=jnp.float32)        # (H, Sq, dk)
    # merged @ w_o  ==  sum_h ctx[h] @ w_o[h*dk:(h+1)*dk, :]  (w_o pre-reshaped)
    proj = jnp.einsum("hqd,hdn->hqn", ctx.astype(jnp.bfloat16), wo_ref[...],
                      preferred_element_type=jnp.float32)       # (H, Sq, D)
    out = jnp.sum(proj, axis=0) + bo_ref[...].astype(jnp.float32) \
          + r_ref[0].astype(jnp.float32)
    o_ref[0] = out.astype(o_ref.dtype)


def _ffn_kernel(alpha_ref, bias_ref, x_ref, w1_ref, b1_ref, w2_ref, b2_ref, o_ref,
                *, eps):
    """o = x + relu(LN(x) @ w1 + b1) @ w2 + b2 ; DFF hidden stays in VMEM."""
    x = x_ref[...].astype(jnp.float32)
    nx = _layernorm_f32(x, alpha_ref[0], bias_ref[0], eps)
    h = jnp.dot(nx.astype(jnp.bfloat16), w1_ref[...],
                preferred_element_type=jnp.float32)
    h = jnp.maximum(h + b1_ref[...].astype(jnp.float32), 0.0)
    out = jnp.dot(h.astype(jnp.bfloat16), w2_ref[...],
                  preferred_element_type=jnp.float32)
    out = out + b2_ref[...].astype(jnp.float32) + x
    o_ref[...] = out.astype(o_ref.dtype)


# ---------------------------------------------------------------------------
# pallas_call wrappers
# ---------------------------------------------------------------------------
def proj(x2d, w, b, *, ln=None, splits=None, out_dtype=jnp.bfloat16):
    """y = (LN?(x) @ w + b), optionally split along the output features."""
    rows, kdim = x2d.shape
    n = w.shape[1]
    if splits is None:
        splits = (n,)
    splits = tuple(int(s) for s in splits)
    tr = _row_tile(rows)
    grid = (pl.cdiv(rows, tr),)
    has_ln = ln is not None
    kernel = _make_proj_kernel(has_ln, splits)

    in_specs, args = [], []
    if has_ln:
        alpha, beta = ln
        in_specs += [pl.BlockSpec(memory_space=pltpu.MemorySpace.SMEM),
                     pl.BlockSpec(memory_space=pltpu.MemorySpace.SMEM)]
        args += [alpha, beta]
    in_specs += [
        pl.BlockSpec((tr, kdim), lambda i: (i, 0)),
        pl.BlockSpec((kdim, n), lambda i: (0, 0)),      # VMEM resident weight
        pl.BlockSpec((1, n), lambda i: (0, 0)),
    ]
    args += [x2d, w, b.reshape(1, n)]

    out_shape = tuple(jax.ShapeDtypeStruct((rows, s), out_dtype) for s in splits)
    out_specs = tuple(pl.BlockSpec((tr, s), lambda i: (i, 0)) for s in splits)

    res = pl.pallas_call(
        kernel,
        out_shape=out_shape,
        grid_spec=pltpu.PrefetchScalarGridSpec(
            num_scalar_prefetch=0, grid=grid,
            in_specs=in_specs, out_specs=list(out_specs)),
        compiler_params=_compiler_params(("parallel",)),
    )(*args)
    return res[0] if len(splits) == 1 else res


def attention_wo_residual(qh, kh, vh, mask, w_o_r, b_o, residual, *, scale):
    """qh: (B,H,Sq,dk) bf16; kh/vh: (B,H,Sk,dk) bf16; mask: (B,Sq,Sk) int32;
    w_o_r: (H,dk,D) bf16; residual: (B,Sq,D) f32.  Returns (B,Sq,D) f32."""
    B, H, Sq, dk = qh.shape
    Sk = kh.shape[2]
    D = w_o_r.shape[2]
    kernel = partial(_attn_kernel, scale=scale)
    return pl.pallas_call(
        kernel,
        out_shape=jax.ShapeDtypeStruct((B, Sq, D), jnp.float32),
        grid_spec=pltpu.PrefetchScalarGridSpec(
            num_scalar_prefetch=0,
            grid=(B,),
            in_specs=[
                pl.BlockSpec((1, H, Sq, dk), lambda b: (b, 0, 0, 0)),
                pl.BlockSpec((1, H, Sk, dk), lambda b: (b, 0, 0, 0)),
                pl.BlockSpec((1, H, Sk, dk), lambda b: (b, 0, 0, 0)),
                pl.BlockSpec((1, Sq, Sk), lambda b: (b, 0, 0)),
                pl.BlockSpec((H, dk, D), lambda b: (0, 0, 0)),   # VMEM resident
                pl.BlockSpec((1, D), lambda b: (0, 0)),
                pl.BlockSpec((1, Sq, D), lambda b: (b, 0, 0)),
            ],
            out_specs=pl.BlockSpec((1, Sq, D), lambda b: (b, 0, 0)),
        ),
        compiler_params=_compiler_params(("parallel",)),
    )(qh, kh, vh, mask, w_o_r, b_o.reshape(1, D), residual)


def ffn_block(x2d, alpha, bias, w1, b1, w2, b2):
    rows, d = x2d.shape
    dff = w1.shape[1]
    tr = _row_tile(rows)
    grid = (pl.cdiv(rows, tr),)
    kernel = partial(_ffn_kernel, eps=_EPS)
    return pl.pallas_call(
        kernel,
        out_shape=jax.ShapeDtypeStruct((rows, d), jnp.float32),
        grid_spec=pltpu.PrefetchScalarGridSpec(
            num_scalar_prefetch=0, grid=grid,
            in_specs=[
                pl.BlockSpec(memory_space=pltpu.MemorySpace.SMEM),
                pl.BlockSpec(memory_space=pltpu.MemorySpace.SMEM),
                pl.BlockSpec((tr, d), lambda i: (i, 0)),
                pl.BlockSpec((d, dff), lambda i: (0, 0)),
                pl.BlockSpec((1, dff), lambda i: (0, 0)),
                pl.BlockSpec((dff, d), lambda i: (0, 0)),
                pl.BlockSpec((1, d), lambda i: (0, 0)),
            ],
            out_specs=pl.BlockSpec((tr, d), lambda i: (i, 0)),
        ),
        compiler_params=_compiler_params(("parallel",)),
    )(alpha, bias, x2d, w1, b1.reshape(1, dff), w2, b2.reshape(1, d))


# ---------------------------------------------------------------------------
# Parameter pre-fusion (done ONCE, outside the jitted forward)
# ---------------------------------------------------------------------------
def prepare_params(raw, h):
    d = raw["self_attn"]["w_q"].shape[0]
    dk = d // h
    bf = jnp.bfloat16

    def prep_attn(p):
        return {
            "w_qkv": jnp.concatenate([p["w_q"], p["w_k"], p["w_v"]], axis=1).astype(bf),
            "b_qkv": jnp.concatenate([p["b_q"], p["b_k"], p["b_v"]]).astype(jnp.float32),
            "w_q": p["w_q"].astype(bf),
            "b_q": p["b_q"].astype(jnp.float32),
            "w_kv": jnp.concatenate([p["w_k"], p["w_v"]], axis=1).astype(bf),
            "b_kv": jnp.concatenate([p["b_k"], p["b_v"]]).astype(jnp.float32),
            "w_o_r": p["w_o"].reshape(h, dk, d).astype(bf),
            "b_o": p["b_o"].astype(jnp.float32),
        }

    return {
        "self_attn": prep_attn(raw["self_attn"]),
        "cross_attn": prep_attn(raw["cross_attn"]),
        "ffn": {"w1": raw["ffn"]["w1"].astype(bf), "b1": raw["ffn"]["b1"].astype(jnp.float32),
                "w2": raw["ffn"]["w2"].astype(bf), "b2": raw["ffn"]["b2"].astype(jnp.float32)},
        "ln0_alpha": raw["ln0_alpha"].astype(jnp.float32), "ln0_bias": raw["ln0_bias"].astype(jnp.float32),
        "ln1_alpha": raw["ln1_alpha"].astype(jnp.float32), "ln1_bias": raw["ln1_bias"].astype(jnp.float32),
        "ln2_alpha": raw["ln2_alpha"].astype(jnp.float32), "ln2_bias": raw["ln2_bias"].astype(jnp.float32),
    }


# ---------------------------------------------------------------------------
# DecoderBlock forward
# ---------------------------------------------------------------------------
def decoder_block_forward(params, x, encoder_output, src_mask, trg_mask, *, h):
    B, Sq, D = x.shape
    Sk = encoder_output.shape[1]
    dk = D // h
    scale = 1.0 / math.sqrt(dk)
    sa, ca, ff = params["self_attn"], params["cross_attn"], params["ffn"]

    x0 = x.astype(jnp.float32)
    xf = x0.reshape(B * Sq, D)
    encf = encoder_output.reshape(B * Sk, D)

    def split_heads(t2d, S):
        return t2d.reshape(B, S, h, dk).transpose(0, 2, 1, 3)

    # --- residual 0: self-attention (LN fused into QKV; w_o + residual fused) ---
    q, k, v = proj(xf, sa["w_qkv"], sa["b_qkv"],
                   ln=(params["ln0_alpha"], params["ln0_bias"]), splits=(D, D, D))
    x1 = attention_wo_residual(split_heads(q, Sq), split_heads(k, Sq),
                               split_heads(v, Sq), trg_mask,
                               sa["w_o_r"], sa["b_o"], x0, scale=scale)

    # --- residual 1: cross-attention (query normed, encoder output raw) ---
    q = proj(x1.reshape(B * Sq, D), ca["w_q"], ca["b_q"],
             ln=(params["ln1_alpha"], params["ln1_bias"]))
    k, v = proj(encf, ca["w_kv"], ca["b_kv"], splits=(D, D))
    x2 = attention_wo_residual(split_heads(q, Sq), split_heads(k, Sk),
                               split_heads(v, Sk), src_mask,
                               ca["w_o_r"], ca["b_o"], x1, scale=scale)

    # --- residual 2: fully fused FFN (LN -> w1 -> relu -> w2 -> +residual) ---
    x3 = ffn_block(x2.reshape(B * Sq, D), params["ln2_alpha"], params["ln2_bias"],
                   ff["w1"], ff["b1"], ff["w2"], ff["b2"])
    return x3.reshape(B, Sq, D)


# ---------------------------------------------------------------------------
# Pure-JAX fp32 reference (mirrors the PyTorch math, eval-mode dropout)
# ---------------------------------------------------------------------------
def _ref_layernorm(x, alpha, bias, eps=_EPS):
    mean = x.mean(axis=-1, keepdims=True)
    std = jnp.sqrt(jnp.sum((x - mean) ** 2, axis=-1, keepdims=True) / (x.shape[-1] - 1))
    return alpha * (x - mean) / (std + eps) + bias


def _ref_mha(p, q, k, v, mask, h):
    B, Sq, D = q.shape
    Sk = k.shape[1]
    dk = D // h
    qq = (q @ p["w_q"] + p["b_q"]).reshape(B, Sq, h, dk).transpose(0, 2, 1, 3)
    kk = (k @ p["w_k"] + p["b_k"]).reshape(B, Sk, h, dk).transpose(0, 2, 1, 3)
    vv = (v @ p["w_v"] + p["b_v"]).reshape(B, Sk, h, dk).transpose(0, 2, 1, 3)
    scores = jnp.einsum("bhqd,bhkd->bhqk", qq, kk) / math.sqrt(dk)
    scores = jnp.where(mask[:, None, :, :] == 0, -1e20, scores)
    attn = jax.nn.softmax(scores, axis=-1)
    out = jnp.einsum("bhqk,bhkd->bhqd", attn, vv).transpose(0, 2, 1, 3).reshape(B, Sq, D)
    return out @ p["w_o"] + p["b_o"]


def _ref_decoder_block(params, x, enc, src_mask, trg_mask, h):
    n0 = _ref_layernorm(x, params["ln0_alpha"], params["ln0_bias"])
    x = x + _ref_mha(params["self_attn"], n0, n0, n0, trg_mask, h)
    n1 = _ref_layernorm(x, params["ln1_alpha"], params["ln1_bias"])
    x = x + _ref_mha(params["cross_attn"], n1, enc, enc, src_mask, h)
    n2 = _ref_layernorm(x, params["ln2_alpha"], params["ln2_bias"])
    ffp = params["ffn"]
    ffo = jnp.maximum(n2 @ ffp["w1"] + ffp["b1"], 0.0) @ ffp["w2"] + ffp["b2"]
    return x + ffo


# ---------------------------------------------------------------------------
if __name__ == "__main__":
    B, Sq, Sk, D, H, DFF = 2, 8, 8, 32, 4, 64

    key = jax.random.PRNGKey(0)
    keys = iter(jax.random.split(key, 24))

    def mk(shape, scale=0.05):
        return jax.random.normal(next(keys), shape, dtype=jnp.float32) * scale

    def attn_params():
        return {"w_q": mk((D, D)), "b_q": mk((D,)),
                "w_k": mk((D, D)), "b_k": mk((D,)),
                "w_v": mk((D, D)), "b_v": mk((D,)),
                "w_o": mk((D, D)), "b_o": mk((D,))}

    raw_params = {
        "self_attn": attn_params(),
        "cross_attn": attn_params(),
        "ffn": {"w1": mk((D, DFF)), "b1": mk((DFF,)),
                "w2": mk((DFF, D)), "b2": mk((D,))},
        "ln0_alpha": jnp.ones((1,), jnp.float32), "ln0_bias": jnp.zeros((1,), jnp.float32),
        "ln1_alpha": jnp.ones((1,), jnp.float32), "ln1_bias": jnp.zeros((1,), jnp.float32),
        "ln2_alpha": jnp.ones((1,), jnp.float32), "ln2_bias": jnp.zeros((1,), jnp.float32),
    }

    x = jax.random.normal(next(keys), (B, Sq, D), dtype=jnp.float32)
    enc = jax.random.normal(next(keys), (B, Sk, D), dtype=jnp.float32)
    trg_mask = jnp.tile(jnp.tril(jnp.ones((Sq, Sq), jnp.int32))[None, :, :], (B, 1, 1))
    src_mask = jnp.ones((B, Sq, Sk), jnp.int32)

    params = prepare_params(raw_params, H)   # fuse + bf16-cast weights ONCE

    fwd = jax.jit(decoder_block_forward, static_argnames=("h",))
    out = jax.block_until_ready(fwd(params, x, enc, src_mask, trg_mask, h=H))

    ref = _ref_decoder_block(raw_params, x, enc, src_mask, trg_mask, H)
    assert out.shape == (B, Sq, D)
    err = float(jnp.max(jnp.abs(out - ref)))
    # bf16 matmul operands + approx reciprocal vs fp32 reference -> looser tol.
    assert jnp.allclose(out, ref, atol=3e-2, rtol=3e-2), f"max abs err {err}"

    print("KERNEL_OK")
</pallas_src>

<mosaic_0001>
module attributes {stable_mosaic.version = 11 : i64} {
  func.func @kernel(%arg0: i32, %arg1: memref<1xf32, #tpu.memory_space<smem>>, %arg2: memref<1xf32, #tpu.memory_space<smem>>, %arg3: memref<8x32xf32, #tpu.memory_space<vmem>>, %arg4: memref<32x96xbf16, #tpu.memory_space<vmem>>, %arg5: memref<1x96xf32, #tpu.memory_space<vmem>>, %arg6: memref<8x32xbf16, #tpu.memory_space<vmem>>, %arg7: memref<8x32xbf16, #tpu.memory_space<vmem>>, %arg8: memref<8x32xbf16, #tpu.memory_space<vmem>>) attributes {dimension_semantics = [#tpu.dimension_semantics<parallel>], iteration_bounds = array<i64: 2>, scalar_prefetch = 0 : i64, scratch_operands = 0 : i64, tpu.core_type = #tpu.core_type<tc>, window_params = [{transform_indices = @transform_0, window_bounds = array<i64: 1>}, {transform_indices = @transform_1, window_bounds = array<i64: 1>}, {transform_indices = @transform_2, window_bounds = array<i64: 8, 32>}, {pipeline_mode = #tpu.pipeline_mode<synchronous>, transform_indices = @transform_3, window_bounds = array<i64: 32, 96>}, {pipeline_mode = #tpu.pipeline_mode<synchronous>, transform_indices = @transform_4, window_bounds = array<i64: 1, 96>}, {transform_indices = @transform_5, window_bounds = array<i64: 8, 32>}, {transform_indices = @transform_6, window_bounds = array<i64: 8, 32>}, {transform_indices = @transform_7, window_bounds = array<i64: 8, 32>}]} {
    %c0 = arith.constant 0 : index
    %c0_0 = arith.constant 0 : index
    %0 = vector.load %arg3[%c0, %c0_0] : memref<8x32xf32, #tpu.memory_space<vmem>>, vector<8x32xf32>
    %c0_1 = arith.constant 0 : index
    %1 = memref.load %arg1[%c0_1] : memref<1xf32, #tpu.memory_space<smem>>
    %c0_2 = arith.constant 0 : index
    %2 = memref.load %arg2[%c0_2] : memref<1xf32, #tpu.memory_space<smem>>
    %cst = arith.constant dense<0.000000e+00> : vector<8xf32>
    %3 = vector.multi_reduction <add>, %0, %cst [1] : vector<8x32xf32> to vector<8xf32>
    %4 = vector.shape_cast %3 : vector<8xf32> to vector<8x1xf32>
    %cst_3 = arith.constant 3.200000e+01 : f32
    %5 = vector.broadcast %cst_3 : f32 to vector<8x1xf32>
    %6 = arith.divf %4, %5 : vector<8x1xf32>
    %7 = vector.broadcast %6 : vector<8x1xf32> to vector<8x32xf32>
    %8 = arith.subf %0, %7 : vector<8x32xf32>
    %9 = arith.mulf %8, %8 : vector<8x32xf32>
    %cst_4 = arith.constant dense<0.000000e+00> : vector<8xf32>
    %10 = vector.multi_reduction <add>, %9, %cst_4 [1] : vector<8x32xf32> to vector<8xf32>
    %11 = vector.shape_cast %10 : vector<8xf32> to vector<8x1xf32>
    %cst_5 = arith.constant 3.100000e+01 : f32
    %12 = vector.broadcast %cst_5 : f32 to vector<8x1xf32>
    %13 = arith.divf %11, %12 : vector<8x1xf32>
    %14 = math.sqrt %13 : vector<8x1xf32>
    %15 = vector.broadcast %1 : f32 to vector<8x32xf32>
    %16 = arith.mulf %15, %8 : vector<8x32xf32>
    %cst_6 = arith.constant 9.99999997E-7 : f32
    %17 = vector.broadcast %cst_6 : f32 to vector<8x1xf32>
    %18 = arith.addf %14, %17 : vector<8x1xf32>
    %19 = vector.broadcast %18 : vector<8x1xf32> to vector<8x32xf32>
    %20 = arith.divf %16, %19 : vector<8x32xf32>
    %21 = vector.broadcast %2 : f32 to vector<8x32xf32>
    %22 = arith.addf %20, %21 : vector<8x32xf32>
    %23 = arith.truncf %22 : vector<8x32xf32> to vector<8x32xbf16>
    %c0_7 = arith.constant 0 : index
    %c0_8 = arith.constant 0 : index
    %24 = vector.load %arg4[%c0_7, %c0_8] : memref<32x96xbf16, #tpu.memory_space<vmem>>, vector<32x96xbf16>
    %cst_9 = arith.constant dense<0.000000e+00> : vector<8x96xf32>
    %25 = tpu.matmul %23, %24, %cst_9 {dimension_numbers = #tpu.dot_dimension_numbers<[1], [0], [0], [1], [0, 0, 1, 1], [], []>} : vector<8x32xbf16>, vector<32x96xbf16>, vector<8x96xf32> -> vector<8x96xf32>
    %c0_10 = arith.constant 0 : index
    %c0_11 = arith.constant 0 : index
    %26 = vector.load %arg5[%c0_10, %c0_11] : memref<1x96xf32, #tpu.memory_space<vmem>>, vector<1x96xf32>
    %27 = vector.broadcast %26 : vector<1x96xf32> to vector<8x96xf32>
    %28 = arith.addf %25, %27 : vector<8x96xf32>
    %29 = vector.extract_strided_slice %28 {offsets = [0, 0], sizes = [8, 32], strides = [1, 1]} : vector<8x96xf32> to vector<8x32xf32>
    %30 = arith.truncf %29 : vector<8x32xf32> to vector<8x32xbf16>
    %c0_12 = arith.constant 0 : index
    %c0_13 = arith.constant 0 : index
    %31 = vector.load %arg6[%c0_12, %c0_13] : memref<8x32xbf16, #tpu.memory_space<vmem>>, vector<8x32xbf16>
    tpu.vector_store %arg6[%c0_12, %c0_13], %30 {strides = array<i32>} : memref<8x32xbf16, #tpu.memory_space<vmem>>, vector<8x32xbf16>,
    %32 = vector.extract_strided_slice %28 {offsets = [0, 32], sizes = [8, 32], strides = [1, 1]} : vector<8x96xf32> to vector<8x32xf32>
    %33 = arith.truncf %32 : vector<8x32xf32> to vector<8x32xbf16>
    %c0_14 = arith.constant 0 : index
    %c0_15 = arith.constant 0 : index
    %34 = vector.load %arg7[%c0_14, %c0_15] : memref<8x32xbf16, #tpu.memory_space<vmem>>, vector<8x32xbf16>
    tpu.vector_store %arg7[%c0_14, %c0_15], %33 {strides = array<i32>} : memref<8x32xbf16, #tpu.memory_space<vmem>>, vector<8x32xbf16>,
    %35 = vector.extract_strided_slice %28 {offsets = [0, 64], sizes = [8, 32], strides = [1, 1]} : vector<8x96xf32> to vector<8x32xf32>
    %36 = arith.truncf %35 : vector<8x32xf32> to vector<8x32xbf16>
    %c0_16 = arith.constant 0 : index
    %c0_17 = arith.constant 0 : index
    %37 = vector.load %arg8[%c0_16, %c0_17] : memref<8x32xbf16, #tpu.memory_space<vmem>>, vector<8x32xbf16>
    tpu.vector_store %arg8[%c0_16, %c0_17], %36 {strides = array<i32>} : memref<8x32xbf16, #tpu.memory_space<vmem>>, vector<8x32xbf16>,
    return
  }
  func.func @transform_0(%arg0: i32) -> i32 {
    %c0_i32 = arith.constant 0 : i32
    %c0_i32_0 = arith.constant 0 : i32
    return %c0_i32 : i32
  }
  func.func @transform_1(%arg0: i32) -> i32 {
    %c0_i32 = arith.constant 0 : i32
    %c0_i32_0 = arith.constant 0 : i32
    return %c0_i32 : i32
  }
  func.func @transform_2(%arg0: i32) -> (i32, i32) {
    %c0_i32 = arith.constant 0 : i32
    %c0_i32_0 = arith.constant 0 : i32
    return %arg0, %c0_i32 : i32, i32
  }
  func.func @transform_3(%arg0: i32) -> (i32, i32) {
    %c0_i32 = arith.constant 0 : i32
    %c0_i32_0 = arith.constant 0 : i32
    %c0_i32_1 = arith.constant 0 : i32
    return %c0_i32, %c0_i32_0 : i32, i32
  }
  func.func @transform_4(%arg0: i32) -> (i32, i32) {
    %c0_i32 = arith.constant 0 : i32
    %c0_i32_0 = arith.constant 0 : i32
    %c0_i32_1 = arith.constant 0 : i32
    return %c0_i32, %c0_i32_0 : i32, i32
  }
  func.func @transform_5(%arg0: i32) -> (i32, i32) {
    %c0_i32 = arith.constant 0 : i32
    %c0_i32_0 = arith.constant 0 : i32
    return %arg0, %c0_i32 : i32, i32
  }
  func.func @transform_6(%arg0: i32) -> (i32, i32) {
    %c0_i32 = arith.constant 0 : i32
    %c0_i32_0 = arith.constant 0 : i32
    return %arg0, %c0_i32 : i32, i32
  }
  func.func @transform_7(%arg0: i32) -> (i32, i32) {
    %c0_i32 = arith.constant 0 : i32
    %c0_i32_0 = arith.constant 0 : i32
    return %arg0, %c0_i32 : i32, i32
  }
}

module attributes {stable_mosaic.version = 11 : i64} {
  func.func @kernel(%arg0: i32, %arg1: memref<1xf32, #tpu.memory_space<smem>>, %arg2: memref<1xf32, #tpu.memory_space<smem>>, %arg3: memref<8x32xf32, #tpu.memory_space<vmem>>, %arg4: memref<32x32xbf16, #tpu.memory_space<vmem>>, %arg5: memref<1x32xf32, #tpu.memory_space<vmem>>, %arg6: memref<8x32xbf16, #tpu.memory_space<vmem>>) attributes {dimension_semantics = [#tpu.dimension_semantics<parallel>], iteration_bounds = array<i64: 2>, scalar_prefetch = 0 : i64, scratch_operands = 0 : i64, tpu.core_type = #tpu.core_type<tc>, window_params = [{transform_indices = @transform_0, window_bounds = array<i64: 1>}, {transform_indices = @transform_1, window_bounds = array<i64: 1>}, {transform_indices = @transform_2, window_bounds = array<i64: 8, 32>}, {pipeline_mode = #tpu.pipeline_mode<synchronous>, transform_indices = @transform_3, window_bounds = array<i64: 32, 32>}, {pipeline_mode = #tpu.pipeline_mode<synchronous>, transform_indices = @transform_4, window_bounds = array<i64: 1, 32>}, {transform_indices = @transform_5, window_bounds = array<i64: 8, 32>}]} {
    %c0 = arith.constant 0 : index
    %c0_0 = arith.constant 0 : index
    %0 = vector.load %arg3[%c0, %c0_0] : memref<8x32xf32, #tpu.memory_space<vmem>>, vector<8x32xf32>
    %c0_1 = arith.constant 0 : index
    %1 = memref.load %arg1[%c0_1] : memref<1xf32, #tpu.memory_space<smem>>
    %c0_2 = arith.constant 0 : index
    %2 = memref.load %arg2[%c0_2] : memref<1xf32, #tpu.memory_space<smem>>
    %cst = arith.constant dense<0.000000e+00> : vector<8xf32>
    %3 = vector.multi_reduction <add>, %0, %cst [1] : vector<8x32xf32> to vector<8xf32>
    %4 = vector.shape_cast %3 : vector<8xf32> to vector<8x1xf32>
    %cst_3 = arith.constant 3.200000e+01 : f32
    %5 = vector.broadcast %cst_3 : f32 to vector<8x1xf32>
    %6 = arith.divf %4, %5 : vector<8x1xf32>
    %7 = vector.broadcast %6 : vector<8x1xf32> to vector<8x32xf32>
    %8 = arith.subf %0, %7 : vector<8x32xf32>
    %9 = arith.mulf %8, %8 : vector<8x32xf32>
    %cst_4 = arith.constant dense<0.000000e+00> : vector<8xf32>
    %10 = vector.multi_reduction <add>, %9, %cst_4 [1] : vector<8x32xf32> to vector<8xf32>
    %11 = vector.shape_cast %10 : vector<8xf32> to vector<8x1xf32>
    %cst_5 = arith.constant 3.100000e+01 : f32
    %12 = vector.broadcast %cst_5 : f32 to vector<8x1xf32>
    %13 = arith.divf %11, %12 : vector<8x1xf32>
    %14 = math.sqrt %13 : vector<8x1xf32>
    %15 = vector.broadcast %1 : f32 to vector<8x32xf32>
    %16 = arith.mulf %15, %8 : vector<8x32xf32>
    %cst_6 = arith.constant 9.99999997E-7 : f32
    %17 = vector.broadcast %cst_6 : f32 to vector<8x1xf32>
    %18 = arith.addf %14, %17 : vector<8x1xf32>
    %19 = vector.broadcast %18 : vector<8x1xf32> to vector<8x32xf32>
    %20 = arith.divf %16, %19 : vector<8x32xf32>
    %21 = vector.broadcast %2 : f32 to vector<8x32xf32>
    %22 = arith.addf %20, %21 : vector<8x32xf32>
    %23 = arith.truncf %22 : vector<8x32xf32> to vector<8x32xbf16>
    %c0_7 = arith.constant 0 : index
    %c0_8 = arith.constant 0 : index
    %24 = vector.load %arg4[%c0_7, %c0_8] : memref<32x32xbf16, #tpu.memory_space<vmem>>, vector<32x32xbf16>
    %cst_9 = arith.constant dense<0.000000e+00> : vector<8x32xf32>
    %25 = tpu.matmul %23, %24, %cst_9 {dimension_numbers = #tpu.dot_dimension_numbers<[1], [0], [0], [1], [0, 0, 1, 1], [], []>} : vector<8x32xbf16>, vector<32x32xbf16>, vector<8x32xf32> -> vector<8x32xf32>
    %c0_10 = arith.constant 0 : index
    %c0_11 = arith.constant 0 : index
    %26 = vector.load %arg5[%c0_10, %c0_11] : memref<1x32xf32, #tpu.memory_space<vmem>>, vector<1x32xf32>
    %27 = vector.broadcast %26 : vector<1x32xf32> to vector<8x32xf32>
    %28 = arith.addf %25, %27 : vector<8x32xf32>
    %29 = arith.truncf %28 : vector<8x32xf32> to vector<8x32xbf16>
    %c0_12 = arith.constant 0 : index
    %c0_13 = arith.constant 0 : index
    %30 = vector.load %arg6[%c0_12, %c0_13] : memref<8x32xbf16, #tpu.memory_space<vmem>>, vector<8x32xbf16>
    tpu.vector_store %arg6[%c0_12, %c0_13], %29 {strides = array<i32>} : memref<8x32xbf16, #tpu.memory_space<vmem>>, vector<8x32xbf16>,
    return
  }
  func.func @transform_0(%arg0: i32) -> i32 {
    %c0_i32 = arith.constant 0 : i32
    %c0_i32_0 = arith.constant 0 : i32
    return %c0_i32 : i32
  }
  func.func @transform_1(%arg0: i32) -> i32 {
    %c0_i32 = arith.constant 0 : i32
    %c0_i32_0 = arith.constant 0 : i32
    return %c0_i32 : i32
  }
  func.func @transform_2(%arg0: i32) -> (i32, i32) {
    %c0_i32 = arith.constant 0 : i32
    %c0_i32_0 = arith.constant 0 : i32
    return %arg0, %c0_i32 : i32, i32
  }
  func.func @transform_3(%arg0: i32) -> (i32, i32) {
    %c0_i32 = arith.constant 0 : i32
    %c0_i32_0 = arith.constant 0 : i32
    %c0_i32_1 = arith.constant 0 : i32
    return %c0_i32, %c0_i32_0 : i32, i32
  }
  func.func @transform_4(%arg0: i32) -> (i32, i32) {
    %c0_i32 = arith.constant 0 : i32
    %c0_i32_0 = arith.constant 0 : i32
    %c0_i32_1 = arith.constant 0 : i32
    return %c0_i32, %c0_i32_0 : i32, i32
  }
  func.func @transform_5(%arg0: i32) -> (i32, i32) {
    %c0_i32 = arith.constant 0 : i32
    %c0_i32_0 = arith.constant 0 : i32
    return %arg0, %c0_i32 : i32, i32
  }
}

module attributes {stable_mosaic.version = 11 : i64} {
  func.func @_attn_kernel(%arg0: i32, %arg1: memref<1x4x8x8xbf16, #tpu.memory_space<vmem>>, %arg2: memref<1x4x8x8xbf16, #tpu.memory_space<vmem>>, %arg3: memref<1x4x8x8xbf16, #tpu.memory_space<vmem>>, %arg4: memref<1x8x8xi32, #tpu.memory_space<vmem>>, %arg5: memref<4x8x32xbf16, #tpu.memory_space<vmem>>, %arg6: memref<1x32xf32, #tpu.memory_space<vmem>>, %arg7: memref<1x8x32xf32, #tpu.memory_space<vmem>>, %arg8: memref<1x8x32xf32, #tpu.memory_space<vmem>>) attributes {dimension_semantics = [#tpu.dimension_semantics<parallel>], iteration_bounds = array<i64: 2>, scalar_prefetch = 0 : i64, scratch_operands = 0 : i64, tpu.core_type = #tpu.core_type<tc>, window_params = [{transform_indices = @transform_0, window_bounds = array<i64: 1, 4, 8, 8>}, {transform_indices = @transform_1, window_bounds = array<i64: 1, 4, 8, 8>}, {transform_indices = @transform_2, window_bounds = array<i64: 1, 4, 8, 8>}, {transform_indices = @transform_3, window_bounds = array<i64: 1, 8, 8>}, {pipeline_mode = #tpu.pipeline_mode<synchronous>, transform_indices = @transform_4, window_bounds = array<i64: 4, 8, 32>}, {pipeline_mode = #tpu.pipeline_mode<synchronous>, transform_indices = @transform_5, window_bounds = array<i64: 1, 32>}, {transform_indices = @transform_6, window_bounds = array<i64: 1, 8, 32>}, {transform_indices = @transform_7, window_bounds = array<i64: 1, 8, 32>}]} {
    %c0 = arith.constant 0 : index
    %c0_0 = arith.constant 0 : index
    %c0_1 = arith.constant 0 : index
    %c0_2 = arith.constant 0 : index
    %0 = vector.load %arg1[%c0, %c0_0, %c0_1, %c0_2] : memref<1x4x8x8xbf16, #tpu.memory_space<vmem>>, vector<1x4x8x8xbf16>
    %1 = vector.shape_cast %0 : vector<1x4x8x8xbf16> to vector<4x8x8xbf16>
    %c0_3 = arith.constant 0 : index
    %c0_4 = arith.constant 0 : index
    %c0_5 = arith.constant 0 : index
    %c0_6 = arith.constant 0 : index
    %2 = vector.load %arg2[%c0_3, %c0_4, %c0_5, %c0_6] : memref<1x4x8x8xbf16, #tpu.memory_space<vmem>>, vector<1x4x8x8xbf16>
    %3 = vector.shape_cast %2 : vector<1x4x8x8xbf16> to vector<4x8x8xbf16>
    %c0_7 = arith.constant 0 : index
    %c0_8 = arith.constant 0 : index
    %c0_9 = arith.constant 0 : index
    %c0_10 = arith.constant 0 : index
    %4 = vector.load %arg3[%c0_7, %c0_8, %c0_9, %c0_10] : memref<1x4x8x8xbf16, #tpu.memory_space<vmem>>, vector<1x4x8x8xbf16>
    %5 = vector.shape_cast %4 : vector<1x4x8x8xbf16> to vector<4x8x8xbf16>
    %c0_11 = arith.constant 0 : index
    %c0_12 = arith.constant 0 : index
    %c0_13 = arith.constant 0 : index
    %6 = vector.load %arg4[%c0_11, %c0_12, %c0_13] : memref<1x8x8xi32, #tpu.memory_space<vmem>>, vector<1x8x8xi32>
    %7 = vector.shape_cast %6 : vector<1x8x8xi32> to vector<8x8xi32>
    "tpu.trace_start"() <{level = 10 : i32, message = "hqd,hkd->hqk"}> : () -> ()
    %cst = arith.constant dense<0.000000e+00> : vector<4x8x8xf32>
    %8 = tpu.matmul %1, %3, %cst {dimension_numbers = #tpu.dot_dimension_numbers<[2], [2], [1], [1], [0, 0, 0, 1, 1, 1], [0], [0]>} : vector<4x8x8xbf16>, vector<4x8x8xbf16>, vector<4x8x8xf32> -> vector<4x8x8xf32>
    "tpu.trace_stop"() : () -> ()
    %cst_14 = arith.constant 0.353553385 : f32
    %9 = vector.broadcast %cst_14 : f32 to vector<4x8x8xf32>
    %10 = arith.mulf %8, %9 : vector<4x8x8xf32>
    %11 = vector.shape_cast %7 : vector<8x8xi32> to vector<1x8x8xi32>
    %c0_i32 = arith.constant 0 : i32
    %12 = vector.broadcast %c0_i32 : i32 to vector<1x8x8xi32>
    %13 = arith.cmpi eq, %11, %12 : vector<1x8x8xi32>
    %cst_15 = arith.constant -1.000000e+20 : f32
    %14 = vector.shape_cast %13 : vector<1x8x8xi1> to vector<1x8x8xi1>
    %15 = vector.broadcast %14 : vector<1x8x8xi1> to vector<4x8x8xi1>
    %16 = vector.broadcast %cst_15 : f32 to vector<4x8x8xf32>
    %17 = arith.select %15, %16, %10 : vector<4x8x8xi1>, vector<4x8x8xf32>
    %cst_16 = arith.constant dense<0xFF800000> : vector<4x8xf32>
    %18 = vector.multi_reduction <maximumf>, %17, %cst_16 [2] : vector<4x8x8xf32> to vector<4x8xf32>
    %19 = vector.shape_cast %18 : vector<4x8xf32> to vector<4x8x1xf32>
    %20 = vector.broadcast %19 : vector<4x8x1xf32> to vector<4x8x8xf32>
    %21 = arith.subf %17, %20 : vector<4x8x8xf32>
    %22 = math.exp %21 : vector<4x8x8xf32>
    %cst_17 = arith.constant dense<0.000000e+00> : vector<4x8xf32>
    %23 = vector.multi_reduction <add>, %22, %cst_17 [2] : vector<4x8x8xf32> to vector<4x8xf32>
    %24 = vector.shape_cast %23 : vector<4x8xf32> to vector<4x8x1xf32>
    %25 = tpu.reciprocal %24 {approx = true} : vector<4x8x1xf32> -> vector<4x8x1xf32>
    %26 = vector.broadcast %25 : vector<4x8x1xf32> to vector<4x8x8xf32>
    %27 = arith.mulf %22, %26 : vector<4x8x8xf32>
    %28 = arith.truncf %27 : vector<4x8x8xf32> to vector<4x8x8xbf16>
    "tpu.trace_start"() <{level = 10 : i32, message = "hqk,hkd->hqd"}> : () -> ()
    %cst_18 = arith.constant dense<0.000000e+00> : vector<4x8x8xf32>
    %29 = tpu.matmul %28, %5, %cst_18 {dimension_numbers = #tpu.dot_dimension_numbers<[2], [1], [1], [2], [0, 0, 0, 1, 1, 2], [0], [0]>} : vector<4x8x8xbf16>, vector<4x8x8xbf16>, vector<4x8x8xf32> -> vector<4x8x8xf32>
    "tpu.trace_stop"() : () -> ()
    %30 = arith.truncf %29 : vector<4x8x8xf32> to vector<4x8x8xbf16>
    %c0_19 = arith.constant 0 : index
    %c0_20 = arith.constant 0 : index
    %c0_21 = arith.constant 0 : index
    %31 = vector.load %arg5[%c0_19, %c0_20, %c0_21] : memref<4x8x32xbf16, #tpu.memory_space<vmem>>, vector<4x8x32xbf16>
    "tpu.trace_start"() <{level = 10 : i32, message = "hqd,hdn->hqn"}> : () -> ()
    %cst_22 = arith.constant dense<0.000000e+00> : vector<4x8x32xf32>
    %32 = tpu.matmul %30, %31, %cst_22 {dimension_numbers = #tpu.dot_dimension_numbers<[2], [1], [1], [2], [0, 0, 0, 1, 1, 2], [0], [0]>} : vector<4x8x8xbf16>, vector<4x8x32xbf16>, vector<4x8x32xf32> -> vector<4x8x32xf32>
    "tpu.trace_stop"() : () -> ()
    %cst_23 = arith.constant dense<0.000000e+00> : vector<8x32xf32>
    %33 = vector.multi_reduction <add>, %32, %cst_23 [0] : vector<4x8x32xf32> to vector<8x32xf32>
    %c0_24 = arith.constant 0 : index
    %c0_25 = arith.constant 0 : index
    %34 = vector.load %arg6[%c0_24, %c0_25] : memref<1x32xf32, #tpu.memory_space<vmem>>, vector<1x32xf32>
    %35 = vector.broadcast %34 : vector<1x32xf32> to vector<8x32xf32>
    %36 = arith.addf %33, %35 : vector<8x32xf32>
    %c0_26 = arith.constant 0 : index
    %c0_27 = arith.constant 0 : index
    %c0_28 = arith.constant 0 : index
    %37 = vector.load %arg7[%c0_26, %c0_27, %c0_28] : memref<1x8x32xf32, #tpu.memory_space<vmem>>, vector<1x8x32xf32>
    %38 = vector.shape_cast %37 : vector<1x8x32xf32> to vector<8x32xf32>
    %39 = arith.addf %36, %38 : vector<8x32xf32>
    %c0_29 = arith.constant 0 : index
    %c0_30 = arith.constant 0 : index
    %c0_31 = arith.constant 0 : index
    %40 = vector.load %arg8[%c0_29, %c0_30, %c0_31] : memref<1x8x32xf32, #tpu.memory_space<vmem>>, vector<1x8x32xf32>
    %41 = vector.shape_cast %40 : vector<1x8x32xf32> to vector<8x32xf32>
    %42 = vector.shape_cast %39 : vector<8x32xf32> to vector<1x8x32xf32>
    tpu.vector_store %arg8[%c0_29, %c0_30, %c0_31], %42 {strides = array<i32>} : memref<1x8x32xf32, #tpu.memory_space<vmem>>, vector<1x8x32xf32>,
    return
  }
  func.func @transform_0(%arg0: i32) -> (i32, i32, i32, i32) {
    %c0_i32 = arith.constant 0 : i32
    %c0_i32_0 = arith.constant 0 : i32
    %c0_i32_1 = arith.constant 0 : i32
    %c0_i32_2 = arith.constant 0 : i32
    return %arg0, %c0_i32, %c0_i32_0, %c0_i32_1 : i32, i32, i32, i32
  }
  func.func @transform_1(%arg0: i32) -> (i32, i32, i32, i32) {
    %c0_i32 = arith.constant 0 : i32
    %c0_i32_0 = arith.constant 0 : i32
    %c0_i32_1 = arith.constant 0 : i32
    %c0_i32_2 = arith.constant 0 : i32
    return %arg0, %c0_i32, %c0_i32_0, %c0_i32_1 : i32, i32, i32, i32
  }
  func.func @transform_2(%arg0: i32) -> (i32, i32, i32, i32) {
    %c0_i32 = arith.constant 0 : i32
    %c0_i32_0 = arith.constant 0 : i32
    %c0_i32_1 = arith.constant 0 : i32
    %c0_i32_2 = arith.constant 0 : i32
    return %arg0, %c0_i32, %c0_i32_0, %c0_i32_1 : i32, i32, i32, i32
  }
  func.func @transform_3(%arg0: i32) -> (i32, i32, i32) {
    %c0_i32 = arith.constant 0 : i32
    %c0_i32_0 = arith.constant 0 : i32
    %c0_i32_1 = arith.constant 0 : i32
    return %arg0, %c0_i32, %c0_i32_0 : i32, i32, i32
  }
  func.func @transform_4(%arg0: i32) -> (i32, i32, i32) {
    %c0_i32 = arith.constant 0 : i32
    %c0_i32_0 = arith.constant 0 : i32
    %c0_i32_1 = arith.constant 0 : i32
    %c0_i32_2 = arith.constant 0 : i32
    return %c0_i32, %c0_i32_0, %c0_i32_1 : i32, i32, i32
  }
  func.func @transform_5(%arg0: i32) -> (i32, i32) {
    %c0_i32 = arith.constant 0 : i32
    %c0_i32_0 = arith.constant 0 : i32
    %c0_i32_1 = arith.constant 0 : i32
    return %c0_i32, %c0_i32_0 : i32, i32
  }
  func.func @transform_6(%arg0: i32) -> (i32, i32, i32) {
    %c0_i32 = arith.constant 0 : i32
    %c0_i32_0 = arith.constant 0 : i32
    %c0_i32_1 = arith.constant 0 : i32
    return %arg0, %c0_i32, %c0_i32_0 : i32, i32, i32
  }
  func.func @transform_7(%arg0: i32) -> (i32, i32, i32) {
    %c0_i32 = arith.constant 0 : i32
    %c0_i32_0 = arith.constant 0 : i32
    %c0_i32_1 = arith.constant 0 : i32
    return %arg0, %c0_i32, %c0_i32_0 : i32, i32, i32
  }
}

module attributes {stable_mosaic.version = 11 : i64} {
  func.func @kernel(%arg0: i32, %arg1: memref<8x32xf32, #tpu.memory_space<vmem>>, %arg2: memref<32x64xbf16, #tpu.memory_space<vmem>>, %arg3: memref<1x64xf32, #tpu.memory_space<vmem>>, %arg4: memref<8x32xbf16, #tpu.memory_space<vmem>>, %arg5: memref<8x32xbf16, #tpu.memory_space<vmem>>) attributes {dimension_semantics = [#tpu.dimension_semantics<parallel>], iteration_bounds = array<i64: 2>, scalar_prefetch = 0 : i64, scratch_operands = 0 : i64, tpu.core_type = #tpu.core_type<tc>, window_params = [{transform_indices = @transform_0, window_bounds = array<i64: 8, 32>}, {pipeline_mode = #tpu.pipeline_mode<synchronous>, transform_indices = @transform_1, window_bounds = array<i64: 32, 64>}, {pipeline_mode = #tpu.pipeline_mode<synchronous>, transform_indices = @transform_2, window_bounds = array<i64: 1, 64>}, {transform_indices = @transform_3, window_bounds = array<i64: 8, 32>}, {transform_indices = @transform_4, window_bounds = array<i64: 8, 32>}]} {
    %c0 = arith.constant 0 : index
    %c0_0 = arith.constant 0 : index
    %0 = vector.load %arg1[%c0, %c0_0] : memref<8x32xf32, #tpu.memory_space<vmem>>, vector<8x32xf32>
    %1 = arith.truncf %0 : vector<8x32xf32> to vector<8x32xbf16>
    %c0_1 = arith.constant 0 : index
    %c0_2 = arith.constant 0 : index
    %2 = vector.load %arg2[%c0_1, %c0_2] : memref<32x64xbf16, #tpu.memory_space<vmem>>, vector<32x64xbf16>
    %cst = arith.constant dense<0.000000e+00> : vector<8x64xf32>
    %3 = tpu.matmul %1, %2, %cst {dimension_numbers = #tpu.dot_dimension_numbers<[1], [0], [0], [1], [0, 0, 1, 1], [], []>} : vector<8x32xbf16>, vector<32x64xbf16>, vector<8x64xf32> -> vector<8x64xf32>
    %c0_3 = arith.constant 0 : index
    %c0_4 = arith.constant 0 : index
    %4 = vector.load %arg3[%c0_3, %c0_4] : memref<1x64xf32, #tpu.memory_space<vmem>>, vector<1x64xf32>
    %5 = vector.broadcast %4 : vector<1x64xf32> to vector<8x64xf32>
    %6 = arith.addf %3, %5 : vector<8x64xf32>
    %7 = vector.extract_strided_slice %6 {offsets = [0, 0], sizes = [8, 32], strides = [1, 1]} : vector<8x64xf32> to vector<8x32xf32>
    %8 = arith.truncf %7 : vector<8x32xf32> to vector<8x32xbf16>
    %c0_5 = arith.constant 0 : index
    %c0_6 = arith.constant 0 : index
    %9 = vector.load %arg4[%c0_5, %c0_6] : memref<8x32xbf16, #tpu.memory_space<vmem>>, vector<8x32xbf16>
    tpu.vector_store %arg4[%c0_5, %c0_6], %8 {strides = array<i32>} : memref<8x32xbf16, #tpu.memory_space<vmem>>, vector<8x32xbf16>,
    %10 = vector.extract_strided_slice %6 {offsets = [0, 32], sizes = [8, 32], strides = [1, 1]} : vector<8x64xf32> to vector<8x32xf32>
    %11 = arith.truncf %10 : vector<8x32xf32> to vector<8x32xbf16>
    %c0_7 = arith.constant 0 : index
    %c0_8 = arith.constant 0 : index
    %12 = vector.load %arg5[%c0_7, %c0_8] : memref<8x32xbf16, #tpu.memory_space<vmem>>, vector<8x32xbf16>
    tpu.vector_store %arg5[%c0_7, %c0_8], %11 {strides = array<i32>} : memref<8x32xbf16, #tpu.memory_space<vmem>>, vector<8x32xbf16>,
    return
  }
  func.func @transform_0(%arg0: i32) -> (i32, i32) {
    %c0_i32 = arith.constant 0 : i32
    %c0_i32_0 = arith.constant 0 : i32
    return %arg0, %c0_i32 : i32, i32
  }
  func.func @transform_1(%arg0: i32) -> (i32, i32) {
    %c0_i32 = arith.constant 0 : i32
    %c0_i32_0 = arith.constant 0 : i32
    %c0_i32_1 = arith.constant 0 : i32
    return %c0_i32, %c0_i32_0 : i32, i32
  }
  func.func @transform_2(%arg0: i32) -> (i32, i32) {
    %c0_i32 = arith.constant 0 : i32
    %c0_i32_0 = arith.constant 0 : i32
    %c0_i32_1 = arith.constant 0 : i32
    return %c0_i32, %c0_i32_0 : i32, i32
  }
  func.func @transform_3(%arg0: i32) -> (i32, i32) {
    %c0_i32 = arith.constant 0 : i32
    %c0_i32_0 = arith.constant 0 : i32
    return %arg0, %c0_i32 : i32, i32
  }
  func.func @transform_4(%arg0: i32) -> (i32, i32) {
    %c0_i32 = arith.constant 0 : i32
    %c0_i32_0 = arith.constant 0 : i32
    return %arg0, %c0_i32 : i32, i32
  }
}

module attributes {stable_mosaic.version = 11 : i64} {
  func.func @_ffn_kernel(%arg0: i32, %arg1: memref<1xf32, #tpu.memory_space<smem>>, %arg2: memref<1xf32, #tpu.memory_space<smem>>, %arg3: memref<8x32xf32, #tpu.memory_space<vmem>>, %arg4: memref<32x64xbf16, #tpu.memory_space<vmem>>, %arg5: memref<1x64xf32, #tpu.memory_space<vmem>>, %arg6: memref<64x32xbf16, #tpu.memory_space<vmem>>, %arg7: memref<1x32xf32, #tpu.memory_space<vmem>>, %arg8: memref<8x32xf32, #tpu.memory_space<vmem>>) attributes {dimension_semantics = [#tpu.dimension_semantics<parallel>], iteration_bounds = array<i64: 2>, scalar_prefetch = 0 : i64, scratch_operands = 0 : i64, tpu.core_type = #tpu.core_type<tc>, window_params = [{transform_indices = @transform_0, window_bounds = array<i64: 1>}, {transform_indices = @transform_1, window_bounds = array<i64: 1>}, {transform_indices = @transform_2, window_bounds = array<i64: 8, 32>}, {pipeline_mode = #tpu.pipeline_mode<synchronous>, transform_indices = @transform_3, window_bounds = array<i64: 32, 64>}, {pipeline_mode = #tpu.pipeline_mode<synchronous>, transform_indices = @transform_4, window_bounds = array<i64: 1, 64>}, {pipeline_mode = #tpu.pipeline_mode<synchronous>, transform_indices = @transform_5, window_bounds = array<i64: 64, 32>}, {pipeline_mode = #tpu.pipeline_mode<synchronous>, transform_indices = @transform_6, window_bounds = array<i64: 1, 32>}, {transform_indices = @transform_7, window_bounds = array<i64: 8, 32>}]} {
    %c0 = arith.constant 0 : index
    %c0_0 = arith.constant 0 : index
    %0 = vector.load %arg3[%c0, %c0_0] : memref<8x32xf32, #tpu.memory_space<vmem>>, vector<8x32xf32>
    %c0_1 = arith.constant 0 : index
    %1 = memref.load %arg1[%c0_1] : memref<1xf32, #tpu.memory_space<smem>>
    %c0_2 = arith.constant 0 : index
    %2 = memref.load %arg2[%c0_2] : memref<1xf32, #tpu.memory_space<smem>>
    %cst = arith.constant dense<0.000000e+00> : vector<8xf32>
    %3 = vector.multi_reduction <add>, %0, %cst [1] : vector<8x32xf32> to vector<8xf32>
    %4 = vector.shape_cast %3 : vector<8xf32> to vector<8x1xf32>
    %cst_3 = arith.constant 3.200000e+01 : f32
    %5 = vector.broadcast %cst_3 : f32 to vector<8x1xf32>
    %6 = arith.divf %4, %5 : vector<8x1xf32>
    %7 = vector.broadcast %6 : vector<8x1xf32> to vector<8x32xf32>
    %8 = arith.subf %0, %7 : vector<8x32xf32>
    %9 = arith.mulf %8, %8 : vector<8x32xf32>
    %cst_4 = arith.constant dense<0.000000e+00> : vector<8xf32>
    %10 = vector.multi_reduction <add>, %9, %cst_4 [1] : vector<8x32xf32> to vector<8xf32>
    %11 = vector.shape_cast %10 : vector<8xf32> to vector<8x1xf32>
    %cst_5 = arith.constant 3.100000e+01 : f32
    %12 = vector.broadcast %cst_5 : f32 to vector<8x1xf32>
    %13 = arith.divf %11, %12 : vector<8x1xf32>
    %14 = math.sqrt %13 : vector<8x1xf32>
    %15 = vector.broadcast %1 : f32 to vector<8x32xf32>
    %16 = arith.mulf %15, %8 : vector<8x32xf32>
    %cst_6 = arith.constant 9.99999997E-7 : f32
    %17 = vector.broadcast %cst_6 : f32 to vector<8x1xf32>
    %18 = arith.addf %14, %17 : vector<8x1xf32>
    %19 = vector.broadcast %18 : vector<8x1xf32> to vector<8x32xf32>
    %20 = arith.divf %16, %19 : vector<8x32xf32>
    %21 = vector.broadcast %2 : f32 to vector<8x32xf32>
    %22 = arith.addf %20, %21 : vector<8x32xf32>
    %23 = arith.truncf %22 : vector<8x32xf32> to vector<8x32xbf16>
    %c0_7 = arith.constant 0 : index
    %c0_8 = arith.constant 0 : index
    %24 = vector.load %arg4[%c0_7, %c0_8] : memref<32x64xbf16, #tpu.memory_space<vmem>>, vector<32x64xbf16>
    %cst_9 = arith.constant dense<0.000000e+00> : vector<8x64xf32>
    %25 = tpu.matmul %23, %24, %cst_9 {dimension_numbers = #tpu.dot_dimension_numbers<[1], [0], [0], [1], [0, 0, 1, 1], [], []>} : vector<8x32xbf16>, vector<32x64xbf16>, vector<8x64xf32> -> vector<8x64xf32>
    %c0_10 = arith.constant 0 : index
    %c0_11 = arith.constant 0 : index
    %26 = vector.load %arg5[%c0_10, %c0_11] : memref<1x64xf32, #tpu.memory_space<vmem>>, vector<1x64xf32>
    %27 = vector.broadcast %26 : vector<1x64xf32> to vector<8x64xf32>
    %28 = arith.addf %25, %27 : vector<8x64xf32>
    %cst_12 = arith.constant 0.000000e+00 : f32
    %29 = vector.broadcast %cst_12 : f32 to vector<8x64xf32>
    %30 = arith.maximumf %28, %29 : vector<8x64xf32>
    %31 = arith.truncf %30 : vector<8x64xf32> to vector<8x64xbf16>
    %c0_13 = arith.constant 0 : index
    %c0_14 = arith.constant 0 : index
    %32 = vector.load %arg6[%c0_13, %c0_14] : memref<64x32xbf16, #tpu.memory_space<vmem>>, vector<64x32xbf16>
    %cst_15 = arith.constant dense<0.000000e+00> : vector<8x32xf32>
    %33 = tpu.matmul %31, %32, %cst_15 {dimension_numbers = #tpu.dot_dimension_numbers<[1], [0], [0], [1], [0, 0, 1, 1], [], []>} : vector<8x64xbf16>, vector<64x32xbf16>, vector<8x32xf32> -> vector<8x32xf32>
    %c0_16 = arith.constant 0 : index
    %c0_17 = arith.constant 0 : index
    %34 = vector.load %arg7[%c0_16, %c0_17] : memref<1x32xf32, #tpu.memory_space<vmem>>, vector<1x32xf32>
    %35 = vector.broadcast %34 : vector<1x32xf32> to vector<8x32xf32>
    %36 = arith.addf %33, %35 : vector<8x32xf32>
    %37 = arith.addf %36, %0 : vector<8x32xf32>
    %c0_18 = arith.constant 0 : index
    %c0_19 = arith.constant 0 : index
    %38 = vector.load %arg8[%c0_18, %c0_19] : memref<8x32xf32, #tpu.memory_space<vmem>>, vector<8x32xf32>
    tpu.vector_store %arg8[%c0_18, %c0_19], %37 {strides = array<i32>} : memref<8x32xf32, #tpu.memory_space<vmem>>, vector<8x32xf32>,
    return
  }
  func.func @transform_0(%arg0: i32) -> i32 {
    %c0_i32 = arith.constant 0 : i32
    %c0_i32_0 = arith.constant 0 : i32
    return %c0_i32 : i32
  }
  func.func @transform_1(%arg0: i32) -> i32 {
    %c0_i32 = arith.constant 0 : i32
    %c0_i32_0 = arith.constant 0 : i32
    return %c0_i32 : i32
  }
  func.func @transform_2(%arg0: i32) -> (i32, i32) {
    %c0_i32 = arith.constant 0 : i32
    %c0_i32_0 = arith.constant 0 : i32
    return %arg0, %c0_i32 : i32, i32
  }
  func.func @transform_3(%arg0: i32) -> (i32, i32) {
    %c0_i32 = arith.constant 0 : i32
    %c0_i32_0 = arith.constant 0 : i32
    %c0_i32_1 = arith.constant 0 : i32
    return %c0_i32, %c0_i32_0 : i32, i32
  }
  func.func @transform_4(%arg0: i32) -> (i32, i32) {
    %c0_i32 = arith.constant 0 : i32
    %c0_i32_0 = arith.constant 0 : i32
    %c0_i32_1 = arith.constant 0 : i32
    return %c0_i32, %c0_i32_0 : i32, i32
  }
  func.func @transform_5(%arg0: i32) -> (i32, i32) {
    %c0_i32 = arith.constant 0 : i32
    %c0_i32_0 = arith.constant 0 : i32
    %c0_i32_1 = arith.constant 0 : i32
    return %c0_i32, %c0_i32_0 : i32, i32
  }
  func.func @transform_6(%arg0: i32) -> (i32, i32) {
    %c0_i32 = arith.constant 0 : i32
    %c0_i32_0 = arith.constant 0 : i32
    %c0_i32_1 = arith.constant 0 : i32
    return %c0_i32, %c0_i32_0 : i32, i32
  }
  func.func @transform_7(%arg0: i32) -> (i32, i32) {
    %c0_i32 = arith.constant 0 : i32
    %c0_i32_0 = arith.constant 0 : i32
    return %arg0, %c0_i32 : i32, i32
  }
}

</mosaic_0001>

<bundles_post_ra>
// kernel: decoder_block_forward.9
= control target key start
LH: loop header
LB: loop body
LE: loop exit
PB: predicated region body
PF: predicated region fallthrough
CT: control target
= control target key end

     0   :  { %s444_s15 = smov 0   ;;  %s473_s0 = inlined_call_operand.vmem [shape: f32[16,32], index: 0, kind: input, shape index: {}]   ;;  %s474_s1 = inlined_call_operand.vmem [shape: bf16[32,64], index: 1, kind: input, shape index: {}]   ;;  %s475_s2 = inlined_call_operand.vmem [shape: f32[1,64], index: 2, kind: input, shape index: {}]   ;;  %s476_s3 = inlined_call_operand.vmem [shape: bf16[16,32], index: 3, kind: output, shape index: {0}]   ;;  %s477_s4 = inlined_call_operand.vmem [shape: bf16[16,32], index: 4, kind: output, shape index: {1}]  }
   0x1 LB: > { %s368_s16 = sadd.s32 4294967295, %s414_s15   ;;  %p372_p0 = scmp.ge.s32.totalorder %s414_s15, 1  ;;  %s414_s15 = sphi %s444_s15, %s15_s15  }
   0x2   : > { %p164_p1 = scmp.lt.s32.totalorder %s414_s15, 3 }
   0x4   : > { %p165_p2 = pnand %p372_p0, %p164_p1 }
   0x5   : > { %p192_p3 = scmp.lt.s32.totalorder (!%p165_p2), %s368_s16, 1  ;;  %s418_s5 = smov (!%p165_p2), 96  }
   0x6   : > { %168 = sbr.rel (%p165_p2) target bundleno = 333 (0x14d), region = 32 }
   0xb   : > { %v406_v0 = vld [vmem:[%s474_s1 + $0x8] sm:$0xff]   ;;  %v416_v1 = vmov 0.0   ;;  %v407_v2 = vld [vmem:[%s474_s1] sm:$0xff]   ;;  %vm417_vm0 = vmmov 0   ;;  %s479_s16 = smov (!%p192_p3, %s368_s16), 1  ;;  %vm230_vm1 = vcmask 261120  }
   0xc   : > { %387 = vmatprep.subr.bf16.mxu0 %v416_v1  ;;  %391 = vmatprep.mubr.msk.bf16.mxu0 %vm417_vm0, %v416_v1  ;;  %s373_s21 = sshll.u32 %s479_s16, 3  ;;  %v376_v5 = vld [vmem:[%s475_s2] ss:$0 sm:$0xff]  ;;  %s374_s27 = sshll.u32 %s479_s16, 2  ;;  %vm275_vm2 = vcmask 257024  }
   0xd   : > { %388 = vmatpush3.bf16.msra.mxu0 %v406_v0  ;;  %s195_s24 = scalar_lea.vmem %s473_s0, %s373_s21  ;;  %s199_s30 = scalar_lea.vmem %s476_s3, %s374_s27 }
   0xe   : > { %389 = vmatprep.subr.bf16.mxu0 %v416_v1  ;;  %v205_v3 = vld [vmem:[%s195_s24] sm:$0xff]  ;;  %s203_s8 = scalar_lea.vmem %s477_s4, %s374_s27 }
   0xf   : > { %v206_v4 = vpack.c.bf16 %v205_v3, %v205_v3 }
  0x11   : > { %390 = vmatpush3.bf16.msra.mxu0 %v407_v2 }
  0x14   : > { %392 = vmatmul.mubr.msk.bf16.vlgmr.msra.gmra.mxu0 %vm230_vm1, %v206_v4 }
  0xd4   : > { %v268_v6 = vpop.f32.mrf.mxu0 }
  0xd5   : > { %v269_v7 = vadd.f32 %v376_v5, %v268_v6 }
  0xd6   : > { %v393_v8 = vpop.f32.mrf.mxu0 }
  0xd7   : > { %v274_v9 = vpack.c.bf16 %v269_v7, %v269_v7 }
  0xd8   : > { %v271_v10 = vpop.f32.mrf.mxu0 }
  0xd9   : > { %280 = vrot.lane.b32.xlu0 %v274_v9, %s418_s5  ;;  %276 = vst.msk [vmem:[%s199_s30] sm:$0xf] %vm275_vm2, %v274_v9 }
  0xda   : > { %v394_v11 = vpop.f32.mrf.mxu0 }
 0x14b   : > { %v281_v12 = vpop.permute.xlu0 %280 }
 0x14c   : > { %283 = vst.msk [vmem:[%s203_s8] sm:$0xf] %vm275_vm2, %v281_v12 }
 0x14d PF: > { %s15_s15 = sadd.s32 1, %s414_s15  }
 0x14e   : > { %p12_p4 = scmp.ge.s32.totalorder %s15_s15, 4  }
 0x150   :  { %14 = sbr.rel (!%p12_p4) target bundleno = 1 (0x1), region = 74 }

// kernel: decoder_block_forward.6
= control target key start
LH: loop header
LB: loop body
LE: loop exit
PB: predicated region body
PF: predicated region fallthrough
CT: control target
= control target key end

     0   :  { %s628_s28 = smov 0   ;;  %s667_s0 = inlined_call_operand.<no memory space> [shape: f32[1], index: 0, kind: input, shape index: {}]   ;;  %s668_s1 = inlined_call_operand.<no memory space> [shape: f32[1], index: 1, kind: input, shape index: {}]   ;;  %s669_s2 = inlined_call_operand.vmem [shape: f32[16,32], index: 2, kind: input, shape index: {}]   ;;  %s670_s3 = inlined_call_operand.vmem [shape: bf16[32,96], index: 3, kind: input, shape index: {}]   ;;  %s671_s4 = inlined_call_operand.vmem [shape: f32[1,96], index: 4, kind: input, shape index: {}]   ;;  %s672_s5 = inlined_call_operand.vmem [shape: bf16[16,32], index: 5, kind: output, shape index: {0}]   ;;  %s673_s6 = inlined_call_operand.vmem [shape: bf16[16,32], index: 6, kind: output, shape index: {1}]   ;;  %s674_s7 = inlined_call_operand.vmem [shape: bf16[16,32], index: 7, kind: output, shape index: {2}]  }
   0x1   :  { %13 = sst [smem:[#allocation2]] %s667_s0 }
   0x2   :  { %14 = sst [smem:[#allocation3]] %s668_s1 }
   0x3 LB: > { %s524_s29 = sadd.s32 4294967295, %s576_s28   ;;  %p528_p0 = scmp.ge.s32.totalorder %s576_s28, 1  ;;  %s576_s28 = sphi %s628_s28, %s20_s28  }
   0x4   : > { %p243_p1 = scmp.lt.s32.totalorder %s576_s28, 3 }
   0x6   : > { %p244_p2 = pnand %p528_p0, %p243_p1 }
   0x7   : > { %p281_p3 = scmp.lt.s32.totalorder (!%p244_p2), %s524_s29, 1  ;;  %s299_s13 = sld [smem:[#allocation2]] (!%p244_p2) }
   0x8   : > { %247 = sbr.rel (%p244_p2) target bundleno = 660 (0x294), region = 40  ;;  %s300_s14 = sld [smem:[#allocation3]] (!%p244_p2) }
   0x9   : > { %s580_s21 = smov (!%p244_p2), 96   ;;  %s581_s22 = smov (!%p244_p2), 64  }
   0xd   : > { %s676_s29 = smov (!%p281_p3, %s524_s29), 1  ;;  %vm301_vm0 = vcmask 261120   ;;  %v564_v7 = vld [vmem:[%s670_s3 + $0x8] sm:$0xff]   ;;  %v578_v8 = vmov 0.0   ;;  %vm579_vm1 = vmmov 0   ;;  %v565_v9 = vld [vmem:[%s670_s3] sm:$0xff]   ;;  %v321_v18 = vstv %s299_s13 }
   0xe   : > { %s529_s0 = sshll.u32 %s676_s29, 3  ;;  %544 = vmatprep.subr.bf16.mxu0 %v578_v8  ;;  %548 = vmatprep.mubr.msk.bf16.mxu0 %vm579_vm1, %v578_v8  ;;  %v326_v21 = vstv %s300_s14  ;;  %v533_v25 = vld [vmem:[%s671_s4] ss:$0 sm:$0xff]  ;;  %s530_s17 = sshll.u32 %s676_s29, 2  ;;  %vm396_vm4 = vcmask 257024  }
   0xf   : > { %s284_s8 = scalar_lea.vmem %s669_s2, %s529_s0  ;;  %545 = vmatpush3.bf16.msra.mxu0 %v564_v7  ;;  %s288_s20 = scalar_lea.vmem %s672_s5, %s530_s17 }
  0x10   : > { %v298_v0 = vld [vmem:[%s284_s8] sm:$0xff]  ;;  %546 = vmatprep.subr.bf16.mxu0 %v578_v8  ;;  %s292_s25 = scalar_lea.vmem %s673_s6, %s530_s17  ;;  %s296_s29 = scalar_lea.vmem %s674_s7, %s530_s17 }
  0x11   : > { %v302_v1 = vsel %vm301_vm0, %v298_v0, 0.0 }
  0x12   : > { %303 = vadd.xlane.f32.xlu0 %v302_v1 }
  0x13   : > { %547 = vmatpush3.bf16.msra.mxu0 %v565_v9 }
  0x9b   : > { %v304_v2 = vpop.xlane.xlu0 %303 }
  0x9c   : > { %v306_v3 = vmul.f32 0.03125, %v304_v2 }
  0x9e   : > { %v307_v4 = vsub.f32 %v298_v0, %v306_v3 }
  0xa0   : > { %v308_v5 = vmul.f32 %v307_v4, %v307_v4  ;;  %v322_v19 = vmul.f32 %v321_v18, %v307_v4 }
  0xa2   : > { %v309_v6 = vsel %vm301_vm0, %v308_v5, 0.0 }
  0xa3   : > { %310 = vadd.xlane.f32.xlu0 %v309_v6 }
 0x12c   : > { %v311_v10 = vpop.xlane.xlu0 %310 }
 0x12d   : > { %v313_v11 = vmul.f32 0.032258064, %v311_v10 }
 0x12f   : > { %566 = vrsqrt.f32 %v313_v11  ;;  %vm316_vm2 = vcmp.eq.f32.partialorder %v313_v11, inf  ;;  %v319_v14 = vand.u32 2147483648, %v313_v11  ;;  %vm318_vm3 = vcmp.eq.f32.partialorder %v313_v11, 0.0 }
 0x13c   : > { %v567_v12 = vpop.eup %566 }
 0x13d   : > { %v315_v13 = vmul.f32 %v567_v12, %v313_v11 }
 0x13f   : > { %v317_v15 = vsel %vm316_vm2, %v313_v11, %v315_v13 }
 0x140   : > { %v320_v16 = vsel %vm318_vm3, %v319_v14, %v317_v15 }
 0x141   : > { %v323_v17 = vadd.f32 1e-06, %v320_v16 }
 0x143   : > { %568 = vrcp.f32 %v323_v17 }
 0x150   : > { %v569_v20 = vpop.eup %568 }
 0x151   : > { %v325_v22 = vmul.f32 %v569_v20, %v322_v19 }
 0x153   : > { %v327_v23 = vadd.f32 %v326_v21, %v325_v22 }
 0x155   : > { %v328_v24 = vpack.c.bf16 %v327_v23, %v327_v23 }
 0x157   : > { %549 = vmatmul.mubr.msk.bf16.vlgmr.msra.gmra.mxu0 %vm301_vm0, %v328_v24 }
 0x217   : > { %v389_v26 = vpop.f32.mrf.mxu0 }
 0x218   : > { %v390_v27 = vadd.f32 %v533_v25, %v389_v26 }
 0x219   : > { %v550_v28 = vpop.f32.mrf.mxu0 }
 0x21a   : > { %v395_v29 = vpack.c.bf16 %v390_v27, %v390_v27 }
 0x21b   : > { %v392_v30 = vpop.f32.mrf.mxu0 }
 0x21c   : > { %401 = vrot.lane.b32.xlu1 %v395_v29, %s580_s21  ;;  %397 = vst.msk [vmem:[%s288_s20] sm:$0xf] %vm396_vm4, %v395_v29 }
 0x21d   : > { %v551_v31 = vpop.f32.mrf.mxu0 }
 0x220   : > { %405 = vrot.lane.b32.xlu1 %v395_v29, %s581_s22 }
 0x28e   : > { %v402_v32 = vpop.permute.xlu1 %401 }
 0x28f   : > { %404 = vst.msk [vmem:[%s292_s25] sm:$0xf] %vm396_vm4, %v402_v32 }
 0x292   : > { %v406_v33 = vpop.permute.xlu1 %405 }
 0x293   : > { %408 = vst.msk [vmem:[%s296_s29] sm:$0xf] %vm396_vm4, %v406_v33 }
 0x294 PF: > { %s20_s28 = sadd.s32 1, %s576_s28  }
 0x295   : > { %p17_p4 = scmp.ge.s32.totalorder %s20_s28, 4  }
 0x297   :  { %19 = sbr.rel (!%p17_p4) target bundleno = 3 (0x3), region = 94 }

// kernel: decoder_block_forward.8
= control target key start
LH: loop header
LB: loop body
LE: loop exit
PB: predicated region body
PF: predicated region fallthrough
CT: control target
= control target key end

     0   :  { %s462_s22 = smov 0   ;;  %s495_s0 = inlined_call_operand.<no memory space> [shape: f32[1], index: 0, kind: input, shape index: {}]   ;;  %s496_s1 = inlined_call_operand.<no memory space> [shape: f32[1], index: 1, kind: input, shape index: {}]   ;;  %s497_s2 = inlined_call_operand.vmem [shape: f32[16,32], index: 2, kind: input, shape index: {}]   ;;  %s498_s3 = inlined_call_operand.vmem [shape: bf16[32,32], index: 3, kind: input, shape index: {}]   ;;  %s499_s4 = inlined_call_operand.vmem [shape: f32[1,32], index: 4, kind: input, shape index: {}]   ;;  %s500_s5 = inlined_call_operand.vmem [shape: bf16[16,32], index: 5, kind: output, shape index: {}]  }
   0x1   :  { %10 = sst [smem:[#allocation2]] %s495_s0 }
   0x2   :  { %11 = sst [smem:[#allocation3]] %s496_s1 }
   0x3 LB: > { %s376_s23 = sadd.s32 4294967295, %s422_s22   ;;  %p380_p0 = scmp.ge.s32.totalorder %s422_s22, 1  ;;  %s422_s22 = sphi %s462_s22, %s17_s22  }
   0x4   : > { %p188_p1 = scmp.lt.s32.totalorder %s422_s22, 3 }
   0x6   : > { %p189_p2 = pnand %p380_p0, %p188_p1 }
   0x7   : > { %p214_p3 = scmp.lt.s32.totalorder (!%p189_p2), %s376_s23, 1  ;;  %s224_s30 = sld [smem:[#allocation2]] (!%p189_p2) }
   0x8   : > { %192 = sbr.rel (%p189_p2) target bundleno = 542 (0x21e), region = 40  ;;  %s225_s6 = sld [smem:[#allocation3]] (!%p189_p2) }
   0xd   : > { %s502_s23 = smov (!%p214_p3, %s376_s23), 1  ;;  %vm226_vm0 = vcmask 261120   ;;  %v410_v7 = vld [vmem:[%s498_s3 + $0x8] sm:$0xff]   ;;  %v424_v8 = vmov 0.0   ;;  %vm425_vm1 = vmmov 0   ;;  %v411_v9 = vld [vmem:[%s498_s3] sm:$0xff]   ;;  %v246_v18 = vstv %s224_s30 }
   0xe   : > { %s381_s0 = sshll.u32 %s502_s23, 3  ;;  %392 = vmatprep.subr.bf16.mxu0 %v424_v8  ;;  %396 = vmatprep.mubr.msk.bf16.mxu0 %vm425_vm1, %v424_v8  ;;  %v251_v21 = vstv %s225_s6  ;;  %v383_v25 = vld [vmem:[%s499_s4] ss:$0 sm:$0xff]  ;;  %s382_s9 = sshll.u32 %s502_s23, 2  ;;  %vm321_vm4 = vcmask 257024  }
   0xf   : > { %s217_s25 = scalar_lea.vmem %s497_s2, %s381_s0  ;;  %393 = vmatpush3.bf16.msra.mxu0 %v410_v7  ;;  %s221_s12 = scalar_lea.vmem %s500_s5, %s382_s9 }
  0x10   : > { %v223_v0 = vld [vmem:[%s217_s25] sm:$0xff]  ;;  %394 = vmatprep.subr.bf16.mxu0 %v424_v8 }
  0x11   : > { %v227_v1 = vsel %vm226_vm0, %v223_v0, 0.0 }
  0x12   : > { %228 = vadd.xlane.f32.xlu0 %v227_v1 }
  0x13   : > { %395 = vmatpush3.bf16.msra.mxu0 %v411_v9 }
  0x9b   : > { %v229_v2 = vpop.xlane.xlu0 %228 }
  0x9c   : > { %v231_v3 = vmul.f32 0.03125, %v229_v2 }
  0x9e   : > { %v232_v4 = vsub.f32 %v223_v0, %v231_v3 }
  0xa0   : > { %v233_v5 = vmul.f32 %v232_v4, %v232_v4  ;;  %v247_v19 = vmul.f32 %v246_v18, %v232_v4 }
  0xa2   : > { %v234_v6 = vsel %vm226_vm0, %v233_v5, 0.0 }
  0xa3   : > { %235 = vadd.xlane.f32.xlu0 %v234_v6 }
 0x12c   : > { %v236_v10 = vpop.xlane.xlu0 %235 }
 0x12d   : > { %v238_v11 = vmul.f32 0.032258064, %v236_v10 }
 0x12f   : > { %412 = vrsqrt.f32 %v238_v11  ;;  %vm241_vm2 = vcmp.eq.f32.partialorder %v238_v11, inf  ;;  %v244_v14 = vand.u32 2147483648, %v238_v11  ;;  %vm243_vm3 = vcmp.eq.f32.partialorder %v238_v11, 0.0 }
 0x13c   : > { %v413_v12 = vpop.eup %412 }
 0x13d   : > { %v240_v13 = vmul.f32 %v413_v12, %v238_v11 }
 0x13f   : > { %v242_v15 = vsel %vm241_vm2, %v238_v11, %v240_v13 }
 0x140   : > { %v245_v16 = vsel %vm243_vm3, %v244_v14, %v242_v15 }
 0x141   : > { %v248_v17 = vadd.f32 1e-06, %v245_v16 }
 0x143   : > { %414 = vrcp.f32 %v248_v17 }
 0x150   : > { %v415_v20 = vpop.eup %414 }
 0x151   : > { %v250_v22 = vmul.f32 %v415_v20, %v247_v19 }
 0x153   : > { %v252_v23 = vadd.f32 %v251_v21, %v250_v22 }
 0x155   : > { %v253_v24 = vpack.c.bf16 %v252_v23, %v252_v23 }
 0x157   : > { %397 = vmatmul.mubr.msk.bf16.vlgmr.msra.gmra.mxu0 %vm226_vm0, %v253_v24 }
 0x217   : > { %v314_v26 = vpop.f32.mrf.mxu0 }
 0x218   : > { %v315_v27 = vadd.f32 %v383_v25, %v314_v26 }
 0x219   : > { %v398_v28 = vpop.f32.mrf.mxu0 }
 0x21a   : > { %v320_v29 = vpack.c.bf16 %v315_v27, %v315_v27 }
 0x21b   : > { %v317_v30 = vpop.f32.mrf.mxu0 }
 0x21c   : > { %322 = vst.msk [vmem:[%s221_s12] sm:$0xf] %vm321_vm4, %v320_v29 }
 0x21d   : > { %v399_v31 = vpop.f32.mrf.mxu0 }
 0x21e PF: > { %s17_s22 = sadd.s32 1, %s422_s22  }
 0x21f   : > { %p14_p4 = scmp.ge.s32.totalorder %s17_s22, 4  }
 0x221   :  { %16 = sbr.rel (!%p14_p4) target bundleno = 3 (0x3), region = 70 }

// kernel: decoder_block_forward.7
= control target key start
LH: loop header
LB: loop body
LE: loop exit
PB: predicated region body
PF: predicated region fallthrough
CT: control target
= control target key end

     0   :  { %s1310_s24 = smov 0   ;;  %s1445_s0 = inlined_call_operand.vmem [shape: bf16[2,4,8,8], index: 0, kind: input, shape index: {}]   ;;  %s1446_s1 = inlined_call_operand.vmem [shape: bf16[2,4,8,8], index: 1, kind: input, shape index: {}]   ;;  %s1447_s2 = inlined_call_operand.vmem [shape: bf16[2,4,8,8], index: 2, kind: input, shape index: {}]   ;;  %s1448_s3 = inlined_call_operand.vmem [shape: s32[2,8,8], index: 3, kind: input, shape index: {}]   ;;  %s1449_s4 = inlined_call_operand.vmem [shape: bf16[4,8,32], index: 4, kind: input, shape index: {}]   ;;  %s1450_s5 = inlined_call_operand.vmem [shape: f32[1,32], index: 5, kind: input, shape index: {}]   ;;  %s1451_s6 = inlined_call_operand.vmem [shape: f32[2,8,32], index: 6, kind: input, shape index: {}]   ;;  %s1452_s7 = inlined_call_operand.vmem [shape: f32[2,8,32], index: 7, kind: output, shape index: {}]  }
   0x1 LB: > { %s1106_s25 = sadd.s32 4294967295, %s1266_s24   ;;  %p1110_p0 = scmp.ge.s32.totalorder %s1266_s24, 1  ;;  %s1266_s24 = sphi %s1310_s24, %s17_s24  }
   0x2   : > { %p275_p1 = scmp.lt.s32.totalorder %s1266_s24, 3 }
   0x4   : > { %p276_p2 = pnand %p1110_p0, %p275_p1 }
   0x5   : > { %p324_p3 = scmp.lt.s32.totalorder (!%p276_p2), %s1106_s25, 1 }
   0x6   : > { %279 = sbr.rel (%p276_p2) target bundleno = 941 (0x3ad), region = 48 }
   0xb   : > { %v1268_v0 = vmov 0.0   ;;  %s1454_s25 = smov (!%p324_p3, %s1106_s25), 1  ;;  %vm1269_vm0 = vmmov 0   ;;  %vm365_vm1 = vcmask 64512   ;;  %vm612_vm3 = vcmask 1043456  }
   0xc   : > { %1162 = vmatprep.subr.bf16.mxu0 %v1268_v0  ;;  %1168 = vmatprep.subr.bf16.mxu1 %v1268_v0  ;;  %s1327_s26 = sshll.u32 %s1454_s25, 4  ;;  %s1358_s10 = sshll.u32 %s1454_s25, 3  ;;  %vm986_vm4 = vcmask 261120  }
   0xd   : > { %1164 = vmatprep.mubr.msk.bf16.mxu0 %vm1269_vm0, %v1268_v0  ;;  %1170 = vmatprep.mubr.msk.bf16.mxu1 %vm1269_vm0, %v1268_v0  ;;  %s333_s29 = scalar_lea.vmem %s1446_s1, %s1327_s26  ;;  %s328_s9 = scalar_lea.vmem %s1445_s0, %s1327_s26 }
   0xe   : > { %v356_v1 = vld [vmem:[%s333_s29] sm:$0xf]  ;;  %v357_v2 = vld [vmem:[%s333_s29 + $0x4] sm:$0xf]  ;;  %v358_v5 = vld [vmem:[%s333_s29 + $0x8] sm:$0xf]  ;;  %s342_s13 = scalar_lea.vmem %s1448_s3, %s1358_s10  ;;  %s338_s16 = scalar_lea.vmem %s1447_s2, %s1327_s26 }
   0xf   : > { %v370_v3 = vsel %vm365_vm1, %v356_v1, 0  ;;  %v416_v4 = vsel %vm365_vm1, %v357_v2, 0  ;;  %v359_v6 = vld [vmem:[%s333_s29 + $0xc] sm:$0xf]  ;;  %v352_v7 = vld [vmem:[%s328_s9] sm:$0xf]  ;;  %s346_s28 = scalar_lea.vmem %s1451_s6, %s1358_s10  ;;  %s350_s11 = scalar_lea.vmem %s1452_s7, %s1358_s10 }
  0x10   : > { %1163 = vmatpush3.bf16.xpose.msra.mxu0 %v370_v3  ;;  %1169 = vmatpush3.bf16.xpose.msra.mxu1 %v416_v4  ;;  %v353_v8 = vld [vmem:[%s328_s9 + $0x4] sm:$0xf]  ;;  %v462_v9 = vsel %vm365_vm1, %v358_v5, 0  ;;  %v508_v10 = vsel %vm365_vm1, %v359_v6, 0  ;;  %v354_v11 = vld [vmem:[%s328_s9 + $0x8] sm:$0xf] }
  0x11   : > { %1174 = vmatprep.subr.bf16.mxu0 %v1268_v0  ;;  %1180 = vmatprep.subr.bf16.mxu1 %v1268_v0  ;;  %v355_v12 = vld [vmem:[%s328_s9 + $0xc] sm:$0xf]  ;;  %v364_v13 = vld [vmem:[%s342_s13] sm:$0xff] }
  0x12   : > { %vm554_vm2 = vcmp.eq.s32.totalorder %v364_v13, 0  ;;  %v360_v62 = vld [vmem:[%s338_s16] sm:$0xf]  ;;  %v361_v63 = vld [vmem:[%s338_s16 + $0x4] sm:$0xf] }
  0x13   : > { %v614_v1 = vsel %vm612_vm3, %v360_v62, 0  ;;  %v660_v2 = vsel %vm612_vm3, %v361_v63, 0  ;;  %v363_v13 = vld [vmem:[%s338_s16 + $0xc] sm:$0xf] }
  0x17   : > { %1165 = vmatmul.mubr.msk.bf16.vlgmr.msra.gmra.mxu0 %vm365_vm1, %v352_v7  ;;  %1171 = vmatmul.mubr.msk.bf16.vlgmr.msra.gmra.mxu1 %vm365_vm1, %v353_v8  ;;  %v362_v8 = vld [vmem:[%s338_s16 + $0x8] sm:$0xf] }
  0x18   : > { %1175 = vmatpush3.bf16.xpose.msra.mxu0 %v462_v9  ;;  %1181 = vmatpush3.bf16.xpose.msra.mxu1 %v508_v10 }
  0x19   : > { %1176 = vmatprep.mubr.msk.bf16.mxu0 %vm1269_vm0, %v1268_v0  ;;  %1182 = vmatprep.mubr.msk.bf16.mxu1 %vm1269_vm0, %v1268_v0 }
  0x1a   : > { %1186 = vmatprep.subr.bf16.mxu0 %v1268_v0  ;;  %1192 = vmatprep.subr.bf16.mxu1 %v1268_v0 }
  0x1f   : > { %1177 = vmatmul.mubr.msk.bf16.vlgmr.msra.gmra.mxu0 %vm365_vm1, %v354_v11  ;;  %1183 = vmatmul.mubr.msk.bf16.vlgmr.msra.gmra.mxu1 %vm365_vm1, %v355_v12  ;;  %v706_v11 = vsel %vm612_vm3, %v362_v8, 0 }
  0x20   : > { %1188 = vmatprep.mubr.msk.bf16.mxu0 %vm1269_vm0, %v1268_v0  ;;  %1194 = vmatprep.mubr.msk.bf16.mxu1 %vm1269_vm0, %v1268_v0 }
  0x21   : > { %1187 = vmatpush3.bf16.msra.mxu0 %v614_v1  ;;  %1193 = vmatpush3.bf16.msra.mxu1 %v660_v2 }
  0x22   : > { %1198 = vmatprep.subr.bf16.mxu0 %v1268_v0  ;;  %1204 = vmatprep.subr.bf16.mxu1 %v1268_v0 }
  0xd7   : > { %v406_v14 = vpop.f32.mrf.mxu0  ;;  %v452_v15 = vpop.f32.mrf.mxu1 }
  0xd8   : > { %v550_v16 = vmul.f32 0.35355338, %v406_v14  ;;  %v551_v17 = vmul.f32 0.35355338, %v452_v15 }
  0xd9   : > { %v1166_v18 = vpop.f32.mrf.mxu0  ;;  %v1172_v19 = vpop.f32.mrf.mxu1 }
  0xda   : > { %v557_v20 = vsel %vm554_vm2, -1e+20, %v550_v16  ;;  %v558_v21 = vsel %vm554_vm2, -1e+20, %v551_v17  ;;  %v752_v16 = vsel %vm612_vm3, %v363_v13, 0 }
  0xdb   : > { %v409_v22 = vpop.f32.mrf.mxu0  ;;  %v455_v23 = vpop.f32.mrf.mxu1  ;;  %v561_v24 = vsel %vm365_vm1, %v557_v20, -inf  ;;  %v564_v27 = vsel %vm365_vm1, %v558_v21, -inf  ;;  %v798_v18 = vld [vmem:[%s1449_s4] sm:$0xf] }
  0xdc   : > { %562 = vmax.xlane.f32.xlu0 %v561_v24 }
  0xdd   : > { %v1167_v25 = vpop.f32.mrf.mxu0  ;;  %v1173_v26 = vpop.f32.mrf.mxu1 }
  0xde   : > { %v799_v25 = vld [vmem:[%s1449_s4 + $0x4] sm:$0xf] }
  0xdf   : > { %v498_v28 = vpop.f32.mrf.mxu0  ;;  %v544_v29 = vpop.f32.mrf.mxu1  ;;  %v852_v26 = vsel %vm612_vm3, %v799_v25, 0 }
  0xe0   : > { %v552_v30 = vmul.f32 0.35355338, %v498_v28  ;;  %v553_v31 = vmul.f32 0.35355338, %v544_v29  ;;  %565 = vmax.xlane.f32.xlu0 %v564_v27  ;;  %v800_v27 = vld [vmem:[%s1449_s4 + $0x8] sm:$0xf] }
  0xe1   : > { %v1178_v32 = vpop.f32.mrf.mxu0  ;;  %v1184_v33 = vpop.f32.mrf.mxu1 }
  0xe2   : > { %v559_v34 = vsel %vm554_vm2, -1e+20, %v552_v30  ;;  %v560_v35 = vsel %vm554_vm2, -1e+20, %v553_v31  ;;  %v898_v30 = vsel %vm612_vm3, %v800_v27, 0 }
  0xe3   : > { %v501_v36 = vpop.f32.mrf.mxu0  ;;  %v547_v37 = vpop.f32.mrf.mxu1  ;;  %v567_v38 = vsel %vm365_vm1, %v559_v34, -inf  ;;  %v570_v41 = vsel %vm365_vm1, %v560_v35, -inf  ;;  %v801_v32 = vld [vmem:[%s1449_s4 + $0xc] sm:$0xf] }
  0xe4   : > { %568 = vmax.xlane.f32.xlu1 %v567_v38  ;;  %v944_v36 = vsel %vm612_vm3, %v801_v32, 0 }
  0xe5   : > { %v1179_v39 = vpop.f32.mrf.mxu0  ;;  %v1185_v40 = vpop.f32.mrf.mxu1 }
  0xe8   : > { %571 = vmax.xlane.f32.xlu1 %v570_v41 }
 0x165   : > { %v563_v42 = vpop.xlane.xlu0 %562 }
 0x166   : > { %v573_v43 = vsub.f32 %v557_v20, %v563_v42 }
 0x168   : > { %v577_v44 = vmul.f32 1.442695, %v573_v43 }
 0x169   : > { %v566_v45 = vpop.xlane.xlu0 %565 }
 0x16a   : > { %1244 = vpow2.f32 %v577_v44  ;;  %v574_v46 = vsub.f32 %v558_v21, %v566_v45  ;;  %v806_v21 = vsel %vm612_vm3, %v798_v18, 0 }
 0x16c   : > { %v579_v47 = vmul.f32 1.442695, %v574_v46 }
 0x16d   : > { %v569_v48 = vpop.xlane.xlu1 %568 }
 0x16e   : > { %1246 = vpow2.f32 %v579_v47  ;;  %v575_v49 = vsub.f32 %v559_v34, %v569_v48 }
 0x170   : > { %v581_v50 = vmul.f32 1.442695, %v575_v49 }
 0x171   : > { %v572_v51 = vpop.xlane.xlu1 %571 }
 0x172   : > { %1248 = vpow2.f32 %v581_v50  ;;  %v576_v52 = vsub.f32 %v560_v35, %v572_v51 }
 0x174   : > { %v583_v53 = vmul.f32 1.442695, %v576_v52 }
 0x176   : > { %1250 = vpow2.f32 %v583_v53 }
 0x177   : > { %v1245_v54 = vpop.eup %1244 }
 0x178   : > { %v585_v55 = vsel %vm365_vm1, %v1245_v54, 0.0 }
 0x179   : > { %586 = vadd.xlane.f32.xlu0 %v585_v55 }
 0x17b   : > { %v1247_v56 = vpop.eup %1246 }
 0x17c   : > { %v588_v57 = vsel %vm365_vm1, %v1247_v56, 0.0 }
 0x17d   : > { %589 = vadd.xlane.f32.xlu1 %v588_v57 }
 0x17f   : > { %v1249_v58 = vpop.eup %1248 }
 0x180   : > { %v591_v59 = vsel %vm365_vm1, %v1249_v58, 0.0 }
 0x181   : > { %592 = vadd.xlane.f32.xlu0 %v591_v59 }
 0x183   : > { %v1251_v60 = vpop.eup %1250 }
 0x184   : > { %v594_v61 = vsel %vm365_vm1, %v1251_v60, 0.0 }
 0x185   : > { %595 = vadd.xlane.f32.xlu1 %v594_v61 }
 0x202   : > { %v587_v3 = vpop.xlane.xlu0 %586 }
 0x203   : > { %1252 = vrcp.f32 %v587_v3 }
 0x206   : > { %v590_v4 = vpop.xlane.xlu1 %589 }
 0x207   : > { %1254 = vrcp.f32 %v590_v4 }
 0x20a   : > { %v593_v5 = vpop.xlane.xlu0 %592 }
 0x20b   : > { %1256 = vrcp.f32 %v593_v5  ;;  %v1132_v5 = vld [vmem:[%s1450_s5] ss:$0 sm:$0xff] }
 0x20e   : > { %v596_v6 = vpop.xlane.xlu1 %595 }
 0x20f   : > { %1258 = vrcp.f32 %v596_v6 }
 0x210   : > { %v1253_v7 = vpop.eup %1252 }
 0x211   : > { %v601_v9 = vmul.f32 %v1253_v7, %v1245_v54 }
 0x213   : > { %v605_v10 = vpack.c.bf16 %v601_v9, %v601_v9  ;;  %v1002_v9 = vld [vmem:[%s346_s28] sm:$0xff] }
 0x214   : > { %v1255_v12 = vpop.eup %1254 }
 0x215   : > { %1189 = vmatmul.mubr.msk.bf16.vlgmr.msra.gmra.mxu0 %vm365_vm1, %v605_v10  ;;  %v602_v14 = vmul.f32 %v1255_v12, %v1247_v56 }
 0x216   : > { %1199 = vmatpush3.bf16.msra.mxu0 %v706_v11  ;;  %1200 = vmatprep.mubr.msk.bf16.mxu0 %vm1269_vm0, %v1268_v0 }
 0x217   : > { %v606_v15 = vpack.c.bf16 %v602_v14, %v602_v14  ;;  %1210 = vmatprep.subr.bf16.mxu0 %v1268_v0 }
 0x218   : > { %v1257_v17 = vpop.eup %1256 }
 0x219   : > { %1195 = vmatmul.mubr.msk.bf16.vlgmr.msra.gmra.mxu1 %vm365_vm1, %v606_v15  ;;  %v603_v19 = vmul.f32 %v1257_v17, %v1249_v58 }
 0x21a   : > { %1205 = vmatpush3.bf16.msra.mxu1 %v752_v16  ;;  %1206 = vmatprep.mubr.msk.bf16.mxu1 %vm1269_vm0, %v1268_v0 }
 0x21b   : > { %v607_v20 = vpack.c.bf16 %v603_v19, %v603_v19  ;;  %1216 = vmatprep.subr.bf16.mxu1 %v1268_v0 }
 0x21c   : > { %v1259_v22 = vpop.eup %1258 }
 0x21d   : > { %1201 = vmatmul.mubr.msk.bf16.vlgmr.msra.gmra.mxu0 %vm365_vm1, %v607_v20  ;;  %v604_v23 = vmul.f32 %v1259_v22, %v1251_v60 }
 0x21e   : > { %1211 = vmatpush3.bf16.msra.mxu0 %v806_v21  ;;  %1212 = vmatprep.mubr.msk.bf16.mxu0 %vm1269_vm0, %v1268_v0 }
 0x21f   : > { %v608_v24 = vpack.c.bf16 %v604_v23, %v604_v23  ;;  %1222 = vmatprep.subr.bf16.mxu0 %v1268_v0 }
 0x221   : > { %1207 = vmatmul.mubr.msk.bf16.vlgmr.msra.gmra.mxu1 %vm365_vm1, %v608_v24 }
 0x222   : > { %1218 = vmatprep.mubr.msk.bf16.mxu1 %vm1269_vm0, %v1268_v0  ;;  %1217 = vmatpush3.bf16.msra.mxu1 %v852_v26 }
 0x223   : > { %1228 = vmatprep.subr.bf16.mxu1 %v1268_v0 }
 0x2d5   : > { %v650_v28 = vpop.f32.mrf.mxu0 }
 0x2d6   : > { %v794_v29 = vpack.c.bf16 %v650_v28, %v650_v28 }
 0x2d7   : > { %v1190_v31 = vpop.f32.mrf.mxu0 }
 0x2d8   : > { %1213 = vmatmul.mubr.msk.bf16.vlgmr.msra.gmra.mxu0 %vm365_vm1, %v794_v29 }
 0x2d9   : > { %v653_v33 = vpop.f32.mrf.mxu0  ;;  %v696_v34 = vpop.f32.mrf.mxu1  ;;  %1223 = vmatpush3.bf16.msra.mxu0 %v898_v30  ;;  %1224 = vmatprep.mubr.msk.bf16.mxu0 %vm1269_vm0, %v1268_v0 }
 0x2da   : > { %v795_v35 = vpack.c.bf16 %v696_v34, %v696_v34 }
 0x2db   : > { %v1191_v37 = vpop.f32.mrf.mxu0  ;;  %v1196_v38 = vpop.f32.mrf.mxu1 }
 0x2dc   : > { %1219 = vmatmul.mubr.msk.bf16.vlgmr.msra.gmra.mxu1 %vm365_vm1, %v795_v35 }
 0x2dd   : > { %v699_v39 = vpop.f32.mrf.mxu1  ;;  %v742_v40 = vpop.f32.mrf.mxu0  ;;  %1229 = vmatpush3.bf16.msra.mxu1 %v944_v36  ;;  %1230 = vmatprep.mubr.msk.bf16.mxu1 %vm1269_vm0, %v1268_v0 }
 0x2de   : > { %v796_v41 = vpack.c.bf16 %v742_v40, %v742_v40 }
 0x2df   : > { %v1197_v42 = vpop.f32.mrf.mxu1  ;;  %v1202_v43 = vpop.f32.mrf.mxu0 }
 0x2e0   : > { %1225 = vmatmul.mubr.msk.bf16.vlgmr.msra.gmra.mxu0 %vm365_vm1, %v796_v41 }
 0x2e1   : > { %v745_v44 = vpop.f32.mrf.mxu0  ;;  %v788_v45 = vpop.f32.mrf.mxu1 }
 0x2e2   : > { %v797_v46 = vpack.c.bf16 %v788_v45, %v788_v45 }
 0x2e3   : > { %v1203_v47 = vpop.f32.mrf.mxu0  ;;  %v1208_v48 = vpop.f32.mrf.mxu1 }
 0x2e4   : > { %1231 = vmatmul.mubr.msk.bf16.vlgmr.msra.gmra.mxu1 %vm365_vm1, %v797_v46 }
 0x2e5   : > { %v791_v49 = vpop.f32.mrf.mxu1 }
 0x2e7   : > { %v1209_v50 = vpop.f32.mrf.mxu1 }
 0x398   : > { %v842_v51 = vpop.f32.mrf.mxu0 }
 0x399   : > { %v987_v59 = vsel %vm986_vm4, %v842_v51, 0.0 }
 0x39a   : > { %v1214_v52 = vpop.f32.mrf.mxu0 }
 0x39c   : > { %v845_v53 = vpop.f32.mrf.mxu0  ;;  %v888_v54 = vpop.f32.mrf.mxu1 }
 0x39d   : > { %v988_v56 = vsel %vm986_vm4, %v888_v54, 0.0 }
 0x39e   : > { %v1215_v0 = vpop.f32.mrf.mxu0  ;;  %v1220_v55 = vpop.f32.mrf.mxu1  ;;  %v989_v61 = vadd.f32 %v988_v56, %v987_v59 }
 0x3a0   : > { %v891_v57 = vpop.f32.mrf.mxu1  ;;  %v934_v58 = vpop.f32.mrf.mxu0 }
 0x3a1   : > { %v990_v60 = vsel %vm986_vm4, %v934_v58, 0.0 }
 0x3a2   : > { %v1221_v62 = vpop.f32.mrf.mxu1  ;;  %v1226_v63 = vpop.f32.mrf.mxu0  ;;  %v991_v1 = vadd.f32 %v990_v60, %v989_v61 }
 0x3a4   : > { %v937_v2 = vpop.f32.mrf.mxu0  ;;  %v980_v3 = vpop.f32.mrf.mxu1 }
 0x3a5   : > { %v992_v4 = vsel %vm986_vm4, %v980_v3, 0.0 }
 0x3a6   : > { %v993_v6 = vadd.f32 %v992_v4, %v991_v1  ;;  %v1227_v7 = vpop.f32.mrf.mxu0  ;;  %v1232_v8 = vpop.f32.mrf.mxu1 }
 0x3a8   : > { %v1001_v10 = vadd.f32 %v1132_v5, %v993_v6  ;;  %v983_v11 = vpop.f32.mrf.mxu1 }
 0x3aa   : > { %v1003_v12 = vadd.f32 %v1002_v9, %v1001_v10  ;;  %v1233_v13 = vpop.f32.mrf.mxu1 }
 0x3ac   : > { %1004 = vst.msk [vmem:[%s350_s11] sm:$0xff] %vm986_vm4, %v1003_v12 }
 0x3ad PF: > { %s17_s24 = sadd.s32 1, %s1266_s24  }
 0x3ae   : > { %p14_p4 = scmp.ge.s32.totalorder %s17_s24, 4  }
 0x3b0   :  { %16 = sbr.rel (!%p14_p4) target bundleno = 1 (0x1), region = 90 }

// kernel: decoder_block_forward.11
= control target key start
LH: loop header
LB: loop body
LE: loop exit
PB: predicated region body
PF: predicated region fallthrough
CT: control target
= control target key end

     0   :  { %s876_s0 = inlined_call_operand.<no memory space> [shape: f32[1], index: 0, kind: input, shape index: {}]   ;;  %s877_s1 = inlined_call_operand.<no memory space> [shape: f32[1], index: 1, kind: input, shape index: {}]   ;;  %s878_s2 = inlined_call_operand.vmem [shape: f32[16,32], index: 2, kind: input, shape index: {}]   ;;  %s879_s3 = inlined_call_operand.vmem [shape: bf16[32,64], index: 3, kind: input, shape index: {}]   ;;  %s880_s4 = inlined_call_operand.vmem [shape: f32[1,64], index: 4, kind: input, shape index: {}]   ;;  %s881_s5 = inlined_call_operand.vmem [shape: bf16[64,32], index: 5, kind: input, shape index: {}]   ;;  %s882_s6 = inlined_call_operand.vmem [shape: f32[1,32], index: 6, kind: input, shape index: {}]   ;;  %s883_s7 = inlined_call_operand.hbm [shape: f32[16,32], index: 7, kind: output, shape index: {}]  }
   0x1   :  { %12 = sst [smem:[#allocation2]] %s876_s0 }
   0x2   :  { %13 = sst [smem:[#allocation3]] %s877_s1 }
   0x3   :  { %14 = vsyncpa [#allocation5], 0 }
   0x4   :  { %16 = vsyncpa [#allocation5 + $0x1], 0  ;;  %s744_s28 = smov 0   ;;  %s746_s29 = smov 0  }
   0x5   :  { %s748_s30 = smov 0   ;;  %s750_s8 = smov 0  }
   0x6 LB: > { %s765_s0 = sadd.s32 4294967295, %s693_s8   ;;  %s534_s1 = sadd.s32 4294967294, %s693_s8   ;;  %s693_s8 = sphi %s750_s8, %s889_s8   ;;  %s689_s30 = sphi %s748_s30, %s888_s30   ;;  %s685_s29 = sphi %s746_s29, %s887_s29   ;;  %s681_s28 = sphi %s744_s28, %s886_s28  }
   0x7   : > { %s769_s9 = sadd.s32 1, %s693_s8   ;;  %s181_s10 = sadd.s32 1, %s689_s30 }
   0x8   : > { %s178_s11 = ssub.s32 %s693_s8, %s769_s9  ;;  %p191_p0 = scmp.ne.s32.totalorder %s689_s30, %s685_s29 }
   0x9   : > { %p179_p1 = scmp.eq.s32.totalorder %s178_s11, 0  ;;  %p192_p2 = scmp.eq.s32.totalorder %s765_s0, 1 }
   0xa   : > { %p197_p3 = scmp.ne.s32.totalorder %s685_s29, %s681_s28  ;;  %p198_p4 = scmp.eq.s32.totalorder %s534_s1, 1 }
   0xb   : > { %s780_s12 = scalar_select %p179_p1, %s689_s30, %s181_s10  }
   0xc   : > { %p782_p5 = por %p192_p2, %p191_p0  ;;  %p786_p6 = por %p198_p4, %p197_p3 }
   0xd   : > { %p537_p7 = scmp.ge.s32.totalorder %s693_s8, 1  ;;  %p241_p8 = scmp.lt.s32.totalorder %s693_s8, 3 }
   0xf   : > { %p242_p9 = pnand %p537_p7, %p241_p8 }
  0x10   : > { %p272_p10 = scmp.lt.s32.totalorder (!%p242_p9), %s765_s0, 1  ;;  %s278_s1 = sld [smem:[#allocation2]] (!%p242_p9) }
  0x11   : > { %245 = sbr.rel (%p242_p9) target bundleno = 763 (0x2fb), region = 48  ;;  %s279_s10 = sld [smem:[#allocation3]] (!%p242_p9) }
  0x12   : > { %s269_s20 = sand.u32 (!%p242_p9), 1, %s685_s29   ;;  %s551_s24 = sshll.u32 (!%p242_p9), %s765_s0, 7 }
  0x13   : > { %s538_s21 = sshll.u32 (!%p242_p9), %s269_s20, 3 }
  0x14   : > { %s271_s25 = scalar_lea.vmem (!%p242_p9), [#allocation4], %s538_s21 }
  0x15   : > { %s475_s26 = sshll.u32 (!%p242_p9), %s271_s25, 4  ;;  %s836_s26 = int_to_ptr.vmem [resolvable:$true] %s475_s26 }
  0x16   : > { %s273_s15 = scalar_select %p272_p10, %s765_s0, 1  ;;  %vm280_vm0 = vcmask 261120   ;;  %v623_v7 = vld [vmem:[%s879_s3 + $0x8] sm:$0xff]   ;;  %v695_v8 = vmov 0.0   ;;  %vm696_vm1 = vmmov 0   ;;  %v624_v9 = vld [vmem:[%s879_s3] sm:$0xff]   ;;  %v300_v20 = vstv %s278_s1 }
  0x17   : > { %562 = vmatprep.subr.bf16.mxu0 %v695_v8  ;;  %566 = vmatprep.mubr.msk.bf16.mxu0 %vm696_vm1, %v695_v8  ;;  %v625_v10 = vld [vmem:[%s881_s5 + $0x18] sm:$0xff]   ;;  %v626_v11 = vld [vmem:[%s881_s5 + $0x10] sm:$0xff]   ;;  %v305_v23 = vstv %s279_s10  ;;  %v627_v27 = vld [vmem:[%s881_s5 + $0x8] sm:$0xff]   ;;  %vm415_vm4 = vcmask 523264   ;;  %s834_s10 = scalar_lea.hbm %s883_s7, %s551_s24  ;;  %s462_s0 = scalar_lea.sflag [#allocation5], %s269_s20 }
  0x18   : > { %s539_s16 = sshll.u32 %s273_s15, 3  ;;  %563 = vmatpush3.bf16.msra.mxu0 %v623_v7  ;;  %570 = vmatprep.subr.bf16.mxu1 %v695_v8  ;;  %v628_v28 = vld [vmem:[%s881_s5] sm:$0xff]   ;;  %s633_s11 = scalar_lea.vmem %s836_s26, 128 }
  0x19   : > { %s275_s19 = scalar_lea.vmem %s878_s2, %s539_s16  ;;  %564 = vmatprep.subr.bf16.mxu0 %v695_v8  ;;  %578 = vmatprep.mubr.msk.bf16.mxu1 %vm696_vm1, %v695_v8  ;;  %v540_v29 = vld [vmem:[%s880_s4] ss:$0 sm:$0xff]  ;;  %p634_p11 = scmp.ne.s32.totalorder %s836_s26, %s633_s11 }
  0x1a   : > { %v797_v0 = vld [vmem:[%s275_s19] sm:$0xff]  ;;  %571 = vmatpush3.bf16.msra.mxu1 %v625_v10  ;;  %s697_s15 = smov [#allocation4]  }
  0x1b   : > { %v281_v1 = vsel %vm280_vm0, %v797_v0, 0.0  ;;  %572 = vmatprep.subr.bf16.mxu1 %v695_v8  ;;  %v544_v37 = vld [vmem:[%s882_s6] ss:$0 sm:$0xff]  ;;  %p635_p12 = pnand %p634_p11, %p782_p5  ;;  %s637_s16 = sshll.u32 %s697_s15, 4  ;;  %s638_s16 = int_to_ptr.vmem [resolvable:$false] %s637_s16 }
  0x1c   : > { %282 = vadd.xlane.f32.xlu0 %v281_v1  ;;  %565 = vmatpush3.bf16.msra.mxu0 %v624_v9  ;;  %s639_s17 = scalar_lea.vmem %s638_s16, 256  ;;  %p640_p0 = scmp.lt.s32.totalorder %s836_s26, %s638_s16 }
  0x1d   : > { %p636_p13 = pneg %p635_p12  ;;  %p641_p1 = scmp.lt.s32.totalorder %s639_s17, %s633_s11 }
  0x1e   : > { %573 = vmatpush3.bf16.msra.mxu1 %v626_v11 }
  0x1f   : > { %574 = vmatprep.subr.bf16.mxu1 %v695_v8  ;;  %p642_p2 = por %p641_p1, %p640_p0 }
  0x21   : > { %p643_p3 = pnand %p642_p2, %p636_p13 }
  0x22   : > { %575 = vmatpush3.bf16.msra.mxu1 %v627_v27 }
  0x23   : > { %576 = vmatprep.subr.bf16.mxu1 %v695_v8 }
  0x26   : > { %577 = vmatpush3.bf16.msra.mxu1 %v628_v28 }
  0xa5   : > { %v283_v2 = vpop.xlane.xlu0 %282 }
  0xa6   : > { %v285_v3 = vmul.f32 0.03125, %v283_v2 }
  0xa8   : > { %v286_v4 = vsub.f32 %v797_v0, %v285_v3 }
  0xaa   : > { %v287_v5 = vmul.f32 %v286_v4, %v286_v4  ;;  %v301_v21 = vmul.f32 %v300_v20, %v286_v4 }
  0xac   : > { %v288_v6 = vsel %vm280_vm0, %v287_v5, 0.0 }
  0xad   : > { %289 = vadd.xlane.f32.xlu0 %v288_v6 }
 0x136   : > { %v290_v12 = vpop.xlane.xlu0 %289 }
 0x137   : > { %v292_v13 = vmul.f32 0.032258064, %v290_v12 }
 0x139   : > { %629 = vrsqrt.f32 %v292_v13  ;;  %vm295_vm2 = vcmp.eq.f32.partialorder %v292_v13, inf  ;;  %v298_v16 = vand.u32 2147483648, %v292_v13  ;;  %vm297_vm3 = vcmp.eq.f32.partialorder %v292_v13, 0.0 }
 0x146   : > { %v630_v14 = vpop.eup %629 }
 0x147   : > { %v294_v15 = vmul.f32 %v630_v14, %v292_v13 }
 0x149   : > { %v296_v17 = vsel %vm295_vm2, %v292_v13, %v294_v15 }
 0x14a   : > { %v299_v18 = vsel %vm297_vm3, %v298_v16, %v296_v17 }
 0x14b   : > { %v302_v19 = vadd.f32 1e-06, %v299_v18 }
 0x14d   : > { %631 = vrcp.f32 %v302_v19 }
 0x15a   : > { %v632_v22 = vpop.eup %631 }
 0x15b   : > { %v304_v24 = vmul.f32 %v632_v22, %v301_v21 }
 0x15d   : > { %v306_v25 = vadd.f32 %v305_v23, %v304_v24 }
 0x15f   : > { %v307_v26 = vpack.c.bf16 %v306_v25, %v306_v25 }
 0x161   : > { %567 = vmatmul.mubr.msk.bf16.vlgmr.msra.gmra.mxu0 %vm280_vm0, %v307_v26 }
 0x221   : > { %v368_v30 = vpop.f32.mrf.mxu0 }
 0x222   : > { %v369_v31 = vadd.f32 %v540_v29, %v368_v30 }
 0x223   : > { %v568_v32 = vpop.f32.mrf.mxu0 }
 0x224   : > { %v374_v33 = vmax.f32 %v369_v31, 0.0 }
 0x225   : > { %v371_v34 = vpop.f32.mrf.mxu0 }
 0x226   : > { %v375_v35 = vpack.c.bf16 %v374_v33, %v374_v33 }
 0x227   : > { %v569_v36 = vpop.f32.mrf.mxu0 }
 0x228   : > { %579 = vmatmul.mubr.msk.bf16.vlgmr.msra.gmra.mxu1 %vm415_vm4, %v375_v35 }
 0x2e8   : > { %v453_v38 = vpop.f32.mrf.mxu1 }
 0x2e9   : > { %v454_v39 = vadd.f32 %v544_v37, %v453_v38 }
 0x2ea   : > { %v580_v40 = vpop.f32.mrf.mxu1 }
 0x2eb   : > { %v459_v41 = vadd.f32 %v454_v39, %v797_v0 }
 0x2ec   : > { %v456_v42 = vpop.f32.mrf.mxu1 }
 0x2ed   : > { %460 = vst.msk [vmem:[%s271_s25] sm:$0xff] %vm280_vm0, %v459_v41 }
 0x2ee   : > { %v581_v43 = vpop.f32.mrf.mxu1 }
 0x2ef   : > { %646 = shalt.err (!%p643_p3)
}
 0x2f0   : > { %s647_s18 = scalar_lea.hbm %s834_s10, 128  ;;  %s651_s21 = scalar_lea.hbm %s883_s7, 256 }
 0x2f1   : > { %p648_p4 = scmp.ne.s32.totalorder %s834_s10, %s647_s18  ;;  %p652_p9 = scmp.lt.s32.totalorder %s834_s10, %s883_s7 }
 0x2f2   : > { %p653_p10 = scmp.lt.s32.totalorder %s651_s21, %s647_s18 }
 0x2f3   : > { %p649_p7 = pnand %p648_p4, %p782_p5 }
 0x2f4   : > { %p654_p11 = por %p653_p10, %p652_p9 }
 0x2f5   : > { %p650_p8 = pneg %p649_p7 }
 0x2f7   : > { %p655_p12 = pnand %p654_p11, %p650_p8 }
 0x2f9   : > { %658 = shalt.err (!%p655_p12)
}
 0x2fa   : > { %582 = dma.vmem_to_hbm [thread:$0]  (%p782_p5), %s836_s26, 128, %s834_s10, %s462_s0  }
 0x2fb PF: > { %p588_p13 = scmp.ge.s32.totalorder %s693_s8, 2  ;;  %s487_s24 = sand.u32 1, %s681_s28  }
 0x2fc   : > { %s488_s25 = scalar_lea.sflag [#allocation5], %s487_s24 }
 0x2fd   : > { %p585_p0 = pnand %p588_p13, %p786_p6 }
 0x2ff   : > { %p586_p1 = pneg %p585_p0 }
 0x301   : > { %676 = dma.done.wait (%p586_p1), %s488_s25, 128  }
 0x302   : > { %678 = vsyncadd (%p586_p1), %s488_s25, 4294967168  ;;  %p19_p2 = scmp.ge.s32.totalorder %s769_s9, 4   ;;  %s886_s28 = smov %s685_s29 }
 0x303   : > { %s887_s29 = smov %s689_s30  ;;  %s888_s30 = smov %s780_s12 }
 0x304   : > { %s889_s8 = smov %s769_s9  ;;  %21 = sbr.rel (!%p19_p2) target bundleno = 6 (0x6), region = 83 }
 0x309   :  { %493 = vsyncpa [#allocation5], 1 }
 0x30a   :  { %495 = vsyncpa [#allocation5 + $0x1], 1 }

</bundles_post_ra>
